<compile_context>
chip_gen: v7x
topology: tpu7x:2x2x1
jax: 0.10.0
libtpu: 0.0.40
codegen_flags: <defaults>
</compile_context>

<pallas_src>
import math
import functools

import jax
import jax.numpy as jnp
from jax.experimental import pallas as pl
from jax.experimental.pallas import tpu as pltpu


def mha_kernel(q_ref, k_ref, v_ref, mask_ref,
               wq_ref, bq_ref, wk_ref, bk_ref, wv_ref, bv_ref,
               wo_ref, bo_ref, out_ref, *, n_heads, d_k):
    f32 = jnp.float32
    bf16 = jnp.bfloat16

    # Activations for this (batch, query-tile) step; cast to bf16 in-kernel.
    xq = q_ref[...].astype(bf16)           # (TQ, D)
    xk = k_ref[...].astype(bf16)           # (S,  D)
    xv = v_ref[...].astype(bf16)           # (S,  D)
    keep = mask_ref[...] != 0              # (1, S) or (TQ, S); broadcasts over queries

    # Full-width projections on the MXU, f32 accumulation. 1/sqrt(d_k) is already
    # folded into Wq/bq, so scores come out pre-scaled.
    q = jnp.dot(xq, wq_ref[...], preferred_element_type=f32) + bq_ref[...]   # (TQ, D)
    k = jnp.dot(xk, wk_ref[...], preferred_element_type=f32) + bk_ref[...]   # (S,  D)
    v = jnp.dot(xv, wv_ref[...], preferred_element_type=f32) + bv_ref[...]   # (S,  D)
    qb, kb, vb = q.astype(bf16), k.astype(bf16), v.astype(bf16)

    neg = f32(-1e9)
    ctx_heads = []
    # TODO(synk): for large h / S, switch to lax.fori_loop + flash-style online softmax
    # over key tiles instead of materializing full (TQ, S) scores per head.
    for hi in range(n_heads):              # static unroll over heads (h is small)
        lo = hi * d_k
        qh = qb[:, lo:lo + d_k]            # (TQ, d_k) static lane slice
        kh = kb[:, lo:lo + d_k]            # (S,  d_k)
        vh = vb[:, lo:lo + d_k]            # (S,  d_k)

        # Scaled dot-product attention scores (scale pre-folded): (TQ, S).
        s = jnp.einsum('qd,kd->qk', qh, kh, preferred_element_type=f32)
        s = jnp.where(keep, s, neg)

        # Numerically-stable softmax; divide replaced by EUP reciprocal.
        s = s - jnp.max(s, axis=-1, keepdims=True)
        e = jnp.exp(s)
        p = e * pl.reciprocal(jnp.sum(e, axis=-1, keepdims=True), approx=True)

        # Context for this head: (TQ, d_k).
        ctx_heads.append(jnp.dot(p.astype(bf16), vh, preferred_element_type=f32))

    # Re-concatenate heads along lanes and do a single full-width output projection.
    ctx = jnp.concatenate(ctx_heads, axis=-1).astype(bf16)                   # (TQ, D)
    out = jnp.dot(ctx, wo_ref[...], preferred_element_type=f32) + bo_ref[...]
    out_ref[...] = out.astype(out_ref.dtype)


def pack_mha_params(params, d_model, h):
    """One-time weight pack: bf16 (D, D) weights, f32 (1, D) biases.
    Folds 1/sqrt(d_k) into Wq/bq so the kernel never scales the (S, S) score matrix."""
    d_k = d_model // h
    scale = 1.0 / math.sqrt(d_k)
    f32, bf16 = jnp.float32, jnp.bfloat16
    return {
        "wq": (params["wq"].astype(f32) * scale).astype(bf16),
        "bq": (params["bq"].astype(f32) * scale).reshape(1, d_model),
        "wk": params["wk"].astype(bf16),
        "bk": params["bk"].astype(f32).reshape(1, d_model),
        "wv": params["wv"].astype(bf16),
        "bv": params["bv"].astype(f32).reshape(1, d_model),
        "wo": params["wo"].astype(bf16),
        "bo": params["bo"].astype(f32).reshape(1, d_model),
    }


def multi_headed_attention(query, key, value, packed, mask=None, *, h,
                           tq=None, out_dtype=jnp.float32):
    """Fused MHA forward: (B, S, D) x3 -> (B, S, D). Eval-mode (dropout = identity).

    `packed` comes from pack_mha_params (bf16 weights, scale folded into Wq/bq).
    `out_dtype=jnp.bfloat16` halves output writeback if downstream accepts it.
    """
    B, S, D = query.shape
    assert D % h == 0
    d_k = D // h

    # Query-tile size: whole sequence when small (fewer, larger steps — good for
    # single-TC v5e/v6e); capped for long sequences so the per-step working set stays
    # bounded and v7x's two TensorCores get multiple parallel steps.
    if tq is None:
        tq = S if S <= 256 else 256
    if S % tq != 0 or (tq != S and tq % 8 != 0):
        tq = S
    n_q = S // tq

    # Compact int32 mask: (B, 1, S) key-padding or (B, S, S) full — no f32 broadcast.
    if mask is None:
        mask_i = jnp.ones((B, 1, S), jnp.int32)
    else:
        m = jnp.asarray(mask)
        if m.ndim == 2:
            m = m[None]
        assert m.ndim == 3 and m.shape[-1] == S and m.shape[1] in (1, S)
        mask_i = (jnp.broadcast_to(m, (B, m.shape[1], S)) != 0).astype(jnp.int32)
    if mask_i.shape[1] == 1:
        mask_spec = pl.BlockSpec((None, 1, S), lambda b, qi: (b, 0, 0))
    else:
        mask_spec = pl.BlockSpec((None, tq, S), lambda b, qi: (b, qi, 0))

    q_spec = pl.BlockSpec((None, tq, D), lambda b, qi: (b, qi, 0))
    kv_spec = pl.BlockSpec((None, S, D), lambda b, qi: (b, 0, 0))
    w_spec = pl.BlockSpec((D, D), lambda b, qi: (0, 0))   # grid-invariant: DMA'd once
    b_spec = pl.BlockSpec((1, D), lambda b, qi: (0, 0))
    out_spec = pl.BlockSpec((None, tq, D), lambda b, qi: (b, qi, 0))

    kernel = functools.partial(mha_kernel, n_heads=h, d_k=d_k)

    return pl.pallas_call(
        kernel,
        out_shape=jax.ShapeDtypeStruct((B, S, D), out_dtype),
        grid_spec=pltpu.PrefetchScalarGridSpec(
            num_scalar_prefetch=0,
            grid=(B, n_q),
            in_specs=[
                q_spec,      # query (f32, cast in-kernel)
                kv_spec,     # key
                kv_spec,     # value
                mask_spec,   # compact int32 mask
                w_spec, b_spec,   # Wq (scaled), bq (scaled)
                w_spec, b_spec,   # Wk, bk
                w_spec, b_spec,   # Wv, bv
                w_spec, b_spec,   # Wo, bo
            ],
            out_specs=out_spec,
        ),
        compiler_params=pltpu.CompilerParams(
            dimension_semantics=("parallel", "parallel"),
            vmem_limit_bytes=64 * 1024 * 1024),
    )(query, key, value, mask_i,
      packed["wq"], packed["bq"], packed["wk"], packed["bk"],
      packed["wv"], packed["bv"], packed["wo"], packed["bo"])


# ---------------- pure-JAX reference (mirrors the bf16 matmul inputs / f32 acc) --------


def _mm(a, b):
    return jnp.dot(a.astype(jnp.bfloat16), b.astype(jnp.bfloat16),
                   preferred_element_type=jnp.float32)


def mha_reference(query, key, value, params, mask, *, h):
    B, S, D = query.shape
    d_k = D // h

    def lin(x, w, b):
        return _mm(x.reshape(B * S, D), w).reshape(B, S, D) + b

    q = lin(query, params["wq"], params["bq"]).reshape(B, S, h, d_k).transpose(0, 2, 1, 3)
    k = lin(key, params["wk"], params["bk"]).reshape(B, S, h, d_k).transpose(0, 2, 1, 3)
    v = lin(value, params["wv"], params["bv"]).reshape(B, S, h, d_k).transpose(0, 2, 1, 3)

    scores = jnp.einsum("bhqd,bhkd->bhqk",
                        q.astype(jnp.bfloat16), k.astype(jnp.bfloat16),
                        preferred_element_type=jnp.float32) / math.sqrt(d_k)
    if mask is not None:
        m = mask if mask.ndim == 3 else mask[None]
        scores = jnp.where(m[:, None, :, :] != 0, scores, jnp.float32(-1e9))
    p = jax.nn.softmax(scores, axis=-1)
    ctx = jnp.einsum("bhqk,bhkd->bhqd",
                     p.astype(jnp.bfloat16), v.astype(jnp.bfloat16),
                     preferred_element_type=jnp.float32)
    ctx = ctx.transpose(0, 2, 1, 3).reshape(B, S, D)
    return _mm(ctx.reshape(B * S, D), params["wo"]).reshape(B, S, D) + params["bo"]


def init_params(key, d_model):
    ks = jax.random.split(key, 8)
    s = 1.0 / math.sqrt(d_model)
    u = lambda k, shape: jax.random.uniform(k, shape, jnp.float32, -s, s)
    # Weights stored pre-transposed to [in, out] so y = x @ W + b.
    return {
        "wq": u(ks[0], (d_model, d_model)), "bq": u(ks[1], (d_model,)),
        "wk": u(ks[2], (d_model, d_model)), "bk": u(ks[3], (d_model,)),
        "wv": u(ks[4], (d_model, d_model)), "bv": u(ks[5], (d_model,)),
        "wo": u(ks[6], (d_model, d_model)), "bo": u(ks[7], (d_model,)),
    }


if __name__ == "__main__":
    B, S, D, H = 2, 16, 128, 4      # batch=2, seq=16, d_model=128, heads=4 (d_k=32)

    key = jax.random.PRNGKey(0)
    kq, kk, kv, kp = jax.random.split(key, 4)
    query = jax.random.normal(kq, (B, S, D), jnp.float32)
    key_in = jax.random.normal(kk, (B, S, D), jnp.float32)
    value = jax.random.normal(kv, (B, S, D), jnp.float32)
    params = init_params(kp, D)

    # Compact key-padding mask (B, 1, S): hide the last 3 key positions of batch elem 1.
    mask = jnp.ones((B, 1, S), jnp.float32)
    mask = mask.at[1, :, S - 3:].set(0.0)

    packed = pack_mha_params(params, D, H)   # one-time bf16 weight pack
    out = multi_headed_attention(query, key_in, value, packed, mask=mask, h=H)
    out = jax.block_until_ready(out)

    ref = mha_reference(query, key_in, value, params, mask, h=H)
    assert out.shape == (B, S, D)
    err = float(jnp.max(jnp.abs(out - ref)))
    assert jnp.allclose(out, ref, atol=2e-2, rtol=2e-2), err

    print("KERNEL_OK")
</pallas_src>

<mosaic_0001>
module attributes {stable_mosaic.version = 11 : i64} {
  func.func @mha_kernel(%arg0: i32, %arg1: i32, %arg2: memref<1x16x128xf32, #tpu.memory_space<vmem>>, %arg3: memref<1x16x128xf32, #tpu.memory_space<vmem>>, %arg4: memref<1x16x128xf32, #tpu.memory_space<vmem>>, %arg5: memref<1x1x16xi32, #tpu.memory_space<vmem>>, %arg6: memref<128x128xbf16, #tpu.memory_space<vmem>>, %arg7: memref<1x128xf32, #tpu.memory_space<vmem>>, %arg8: memref<128x128xbf16, #tpu.memory_space<vmem>>, %arg9: memref<1x128xf32, #tpu.memory_space<vmem>>, %arg10: memref<128x128xbf16, #tpu.memory_space<vmem>>, %arg11: memref<1x128xf32, #tpu.memory_space<vmem>>, %arg12: memref<128x128xbf16, #tpu.memory_space<vmem>>, %arg13: memref<1x128xf32, #tpu.memory_space<vmem>>, %arg14: memref<1x16x128xf32, #tpu.memory_space<vmem>>) attributes {dimension_semantics = [#tpu.dimension_semantics<parallel>, #tpu.dimension_semantics<parallel>], iteration_bounds = array<i64: 2, 1>, scalar_prefetch = 0 : i64, scratch_operands = 0 : i64, tpu.core_type = #tpu.core_type<tc>, window_params = [{transform_indices = @transform_0, window_bounds = array<i64: 1, 16, 128>}, {transform_indices = @transform_1, window_bounds = array<i64: 1, 16, 128>}, {transform_indices = @transform_2, window_bounds = array<i64: 1, 16, 128>}, {transform_indices = @transform_3, window_bounds = array<i64: 1, 1, 16>}, {pipeline_mode = #tpu.pipeline_mode<synchronous>, transform_indices = @transform_4, window_bounds = array<i64: 128, 128>}, {pipeline_mode = #tpu.pipeline_mode<synchronous>, transform_indices = @transform_5, window_bounds = array<i64: 1, 128>}, {pipeline_mode = #tpu.pipeline_mode<synchronous>, transform_indices = @transform_6, window_bounds = array<i64: 128, 128>}, {pipeline_mode = #tpu.pipeline_mode<synchronous>, transform_indices = @transform_7, window_bounds = array<i64: 1, 128>}, {pipeline_mode = #tpu.pipeline_mode<synchronous>, transform_indices = @transform_8, window_bounds = array<i64: 128, 128>}, {pipeline_mode = #tpu.pipeline_mode<synchronous>, transform_indices = @transform_9, window_bounds = array<i64: 1, 128>}, {pipeline_mode = #tpu.pipeline_mode<synchronous>, transform_indices = @transform_10, window_bounds = array<i64: 128, 128>}, {pipeline_mode = #tpu.pipeline_mode<synchronous>, transform_indices = @transform_11, window_bounds = array<i64: 1, 128>}, {transform_indices = @transform_12, window_bounds = array<i64: 1, 16, 128>}]} {
    %c0 = arith.constant 0 : index
    %c0_0 = arith.constant 0 : index
    %c0_1 = arith.constant 0 : index
    %0 = vector.load %arg2[%c0, %c0_0, %c0_1] : memref<1x16x128xf32, #tpu.memory_space<vmem>>, vector<1x16x128xf32>
    %1 = vector.shape_cast %0 : vector<1x16x128xf32> to vector<16x128xf32>
    %2 = arith.truncf %1 : vector<16x128xf32> to vector<16x128xbf16>
    %c0_2 = arith.constant 0 : index
    %c0_3 = arith.constant 0 : index
    %c0_4 = arith.constant 0 : index
    %3 = vector.load %arg3[%c0_2, %c0_3, %c0_4] : memref<1x16x128xf32, #tpu.memory_space<vmem>>, vector<1x16x128xf32>
    %4 = vector.shape_cast %3 : vector<1x16x128xf32> to vector<16x128xf32>
    %5 = arith.truncf %4 : vector<16x128xf32> to vector<16x128xbf16>
    %c0_5 = arith.constant 0 : index
    %c0_6 = arith.constant 0 : index
    %c0_7 = arith.constant 0 : index
    %6 = vector.load %arg4[%c0_5, %c0_6, %c0_7] : memref<1x16x128xf32, #tpu.memory_space<vmem>>, vector<1x16x128xf32>
    %7 = vector.shape_cast %6 : vector<1x16x128xf32> to vector<16x128xf32>
    %8 = arith.truncf %7 : vector<16x128xf32> to vector<16x128xbf16>
    %c0_8 = arith.constant 0 : index
    %c0_9 = arith.constant 0 : index
    %c0_10 = arith.constant 0 : index
    %9 = vector.load %arg5[%c0_8, %c0_9, %c0_10] : memref<1x1x16xi32, #tpu.memory_space<vmem>>, vector<1x1x16xi32>
    %10 = vector.shape_cast %9 : vector<1x1x16xi32> to vector<1x16xi32>
    %c0_i32 = arith.constant 0 : i32
    %11 = vector.broadcast %c0_i32 : i32 to vector<1x16xi32>
    %12 = arith.cmpi ne, %10, %11 : vector<1x16xi32>
    %c0_11 = arith.constant 0 : index
    %c0_12 = arith.constant 0 : index
    %13 = vector.load %arg6[%c0_11, %c0_12] : memref<128x128xbf16, #tpu.memory_space<vmem>>, vector<128x128xbf16>
    %cst = arith.constant dense<0.000000e+00> : vector<16x128xf32>
    %14 = tpu.matmul %2, %13, %cst {dimension_numbers = #tpu.dot_dimension_numbers<[1], [0], [0], [1], [0, 0, 1, 1], [], []>} : vector<16x128xbf16>, vector<128x128xbf16>, vector<16x128xf32> -> vector<16x128xf32>
    %c0_13 = arith.constant 0 : index
    %c0_14 = arith.constant 0 : index
    %15 = vector.load %arg7[%c0_13, %c0_14] : memref<1x128xf32, #tpu.memory_space<vmem>>, vector<1x128xf32>
    %16 = vector.broadcast %15 : vector<1x128xf32> to vector<16x128xf32>
    %17 = arith.addf %14, %16 : vector<16x128xf32>
    %c0_15 = arith.constant 0 : index
    %c0_16 = arith.constant 0 : index
    %18 = vector.load %arg8[%c0_15, %c0_16] : memref<128x128xbf16, #tpu.memory_space<vmem>>, vector<128x128xbf16>
    %cst_17 = arith.constant dense<0.000000e+00> : vector<16x128xf32>
    %19 = tpu.matmul %5, %18, %cst_17 {dimension_numbers = #tpu.dot_dimension_numbers<[1], [0], [0], [1], [0, 0, 1, 1], [], []>} : vector<16x128xbf16>, vector<128x128xbf16>, vector<16x128xf32> -> vector<16x128xf32>
    %c0_18 = arith.constant 0 : index
    %c0_19 = arith.constant 0 : index
    %20 = vector.load %arg9[%c0_18, %c0_19] : memref<1x128xf32, #tpu.memory_space<vmem>>, vector<1x128xf32>
    %21 = vector.broadcast %20 : vector<1x128xf32> to vector<16x128xf32>
    %22 = arith.addf %19, %21 : vector<16x128xf32>
    %c0_20 = arith.constant 0 : index
    %c0_21 = arith.constant 0 : index
    %23 = vector.load %arg10[%c0_20, %c0_21] : memref<128x128xbf16, #tpu.memory_space<vmem>>, vector<128x128xbf16>
    %cst_22 = arith.constant dense<0.000000e+00> : vector<16x128xf32>
    %24 = tpu.matmul %8, %23, %cst_22 {dimension_numbers = #tpu.dot_dimension_numbers<[1], [0], [0], [1], [0, 0, 1, 1], [], []>} : vector<16x128xbf16>, vector<128x128xbf16>, vector<16x128xf32> -> vector<16x128xf32>
    %c0_23 = arith.constant 0 : index
    %c0_24 = arith.constant 0 : index
    %25 = vector.load %arg11[%c0_23, %c0_24] : memref<1x128xf32, #tpu.memory_space<vmem>>, vector<1x128xf32>
    %26 = vector.broadcast %25 : vector<1x128xf32> to vector<16x128xf32>
    %27 = arith.addf %24, %26 : vector<16x128xf32>
    %28 = arith.truncf %17 : vector<16x128xf32> to vector<16x128xbf16>
    %29 = arith.truncf %22 : vector<16x128xf32> to vector<16x128xbf16>
    %30 = arith.truncf %27 : vector<16x128xf32> to vector<16x128xbf16>
    %31 = vector.extract_strided_slice %28 {offsets = [0, 0], sizes = [16, 32], strides = [1, 1]} : vector<16x128xbf16> to vector<16x32xbf16>
    %32 = vector.extract_strided_slice %29 {offsets = [0, 0], sizes = [16, 32], strides = [1, 1]} : vector<16x128xbf16> to vector<16x32xbf16>
    %33 = vector.extract_strided_slice %30 {offsets = [0, 0], sizes = [16, 32], strides = [1, 1]} : vector<16x128xbf16> to vector<16x32xbf16>
    "tpu.trace_start"() <{level = 10 : i32, message = "qd,kd->qk"}> : () -> ()
    %cst_25 = arith.constant dense<0.000000e+00> : vector<16x16xf32>
    %34 = tpu.matmul %31, %32, %cst_25 {dimension_numbers = #tpu.dot_dimension_numbers<[1], [1], [0], [0], [0, 0, 1, 0], [], []>} : vector<16x32xbf16>, vector<16x32xbf16>, vector<16x16xf32> -> vector<16x16xf32>
    %cst_26 = arith.constant -1.000000e+09 : f32
    "tpu.trace_stop"() : () -> ()
    %35 = vector.shape_cast %12 : vector<1x16xi1> to vector<1x16xi1>
    %36 = vector.broadcast %35 : vector<1x16xi1> to vector<16x16xi1>
    %37 = vector.broadcast %cst_26 : f32 to vector<16x16xf32>
    %38 = arith.select %36, %34, %37 : vector<16x16xi1>, vector<16x16xf32>
    %cst_27 = arith.constant dense<0xFF800000> : vector<16xf32>
    %39 = vector.multi_reduction <maximumf>, %38, %cst_27 [1] : vector<16x16xf32> to vector<16xf32>
    %40 = vector.shape_cast %39 : vector<16xf32> to vector<16x1xf32>
    %41 = vector.broadcast %40 : vector<16x1xf32> to vector<16x16xf32>
    %42 = arith.subf %38, %41 : vector<16x16xf32>
    %43 = math.exp %42 : vector<16x16xf32>
    %cst_28 = arith.constant dense<0.000000e+00> : vector<16xf32>
    %44 = vector.multi_reduction <add>, %43, %cst_28 [1] : vector<16x16xf32> to vector<16xf32>
    %45 = vector.shape_cast %44 : vector<16xf32> to vector<16x1xf32>
    %46 = tpu.reciprocal %45 {approx = true} : vector<16x1xf32> -> vector<16x1xf32>
    %47 = vector.broadcast %46 : vector<16x1xf32> to vector<16x16xf32>
    %48 = arith.mulf %43, %47 : vector<16x16xf32>
    %49 = arith.truncf %48 : vector<16x16xf32> to vector<16x16xbf16>
    %cst_29 = arith.constant dense<0.000000e+00> : vector<16x32xf32>
    %50 = tpu.matmul %49, %33, %cst_29 {dimension_numbers = #tpu.dot_dimension_numbers<[1], [0], [0], [1], [0, 0, 1, 1], [], []>} : vector<16x16xbf16>, vector<16x32xbf16>, vector<16x32xf32> -> vector<16x32xf32>
    %51 = vector.extract_strided_slice %28 {offsets = [0, 32], sizes = [16, 32], strides = [1, 1]} : vector<16x128xbf16> to vector<16x32xbf16>
    %52 = vector.extract_strided_slice %29 {offsets = [0, 32], sizes = [16, 32], strides = [1, 1]} : vector<16x128xbf16> to vector<16x32xbf16>
    %53 = vector.extract_strided_slice %30 {offsets = [0, 32], sizes = [16, 32], strides = [1, 1]} : vector<16x128xbf16> to vector<16x32xbf16>
    "tpu.trace_start"() <{level = 10 : i32, message = "qd,kd->qk"}> : () -> ()
    %cst_30 = arith.constant dense<0.000000e+00> : vector<16x16xf32>
    %54 = tpu.matmul %51, %52, %cst_30 {dimension_numbers = #tpu.dot_dimension_numbers<[1], [1], [0], [0], [0, 0, 1, 0], [], []>} : vector<16x32xbf16>, vector<16x32xbf16>, vector<16x16xf32> -> vector<16x16xf32>
    %cst_31 = arith.constant -1.000000e+09 : f32
    "tpu.trace_stop"() : () -> ()
    %55 = vector.shape_cast %12 : vector<1x16xi1> to vector<1x16xi1>
    %56 = vector.broadcast %55 : vector<1x16xi1> to vector<16x16xi1>
    %57 = vector.broadcast %cst_31 : f32 to vector<16x16xf32>
    %58 = arith.select %56, %54, %57 : vector<16x16xi1>, vector<16x16xf32>
    %cst_32 = arith.constant dense<0xFF800000> : vector<16xf32>
    %59 = vector.multi_reduction <maximumf>, %58, %cst_32 [1] : vector<16x16xf32> to vector<16xf32>
    %60 = vector.shape_cast %59 : vector<16xf32> to vector<16x1xf32>
    %61 = vector.broadcast %60 : vector<16x1xf32> to vector<16x16xf32>
    %62 = arith.subf %58, %61 : vector<16x16xf32>
    %63 = math.exp %62 : vector<16x16xf32>
    %cst_33 = arith.constant dense<0.000000e+00> : vector<16xf32>
    %64 = vector.multi_reduction <add>, %63, %cst_33 [1] : vector<16x16xf32> to vector<16xf32>
    %65 = vector.shape_cast %64 : vector<16xf32> to vector<16x1xf32>
    %66 = tpu.reciprocal %65 {approx = true} : vector<16x1xf32> -> vector<16x1xf32>
    %67 = vector.broadcast %66 : vector<16x1xf32> to vector<16x16xf32>
    %68 = arith.mulf %63, %67 : vector<16x16xf32>
    %69 = arith.truncf %68 : vector<16x16xf32> to vector<16x16xbf16>
    %cst_34 = arith.constant dense<0.000000e+00> : vector<16x32xf32>
    %70 = tpu.matmul %69, %53, %cst_34 {dimension_numbers = #tpu.dot_dimension_numbers<[1], [0], [0], [1], [0, 0, 1, 1], [], []>} : vector<16x16xbf16>, vector<16x32xbf16>, vector<16x32xf32> -> vector<16x32xf32>
    %71 = vector.extract_strided_slice %28 {offsets = [0, 64], sizes = [16, 32], strides = [1, 1]} : vector<16x128xbf16> to vector<16x32xbf16>
    %72 = vector.extract_strided_slice %29 {offsets = [0, 64], sizes = [16, 32], strides = [1, 1]} : vector<16x128xbf16> to vector<16x32xbf16>
    %73 = vector.extract_strided_slice %30 {offsets = [0, 64], sizes = [16, 32], strides = [1, 1]} : vector<16x128xbf16> to vector<16x32xbf16>
    "tpu.trace_start"() <{level = 10 : i32, message = "qd,kd->qk"}> : () -> ()
    %cst_35 = arith.constant dense<0.000000e+00> : vector<16x16xf32>
    %74 = tpu.matmul %71, %72, %cst_35 {dimension_numbers = #tpu.dot_dimension_numbers<[1], [1], [0], [0], [0, 0, 1, 0], [], []>} : vector<16x32xbf16>, vector<16x32xbf16>, vector<16x16xf32> -> vector<16x16xf32>
    %cst_36 = arith.constant -1.000000e+09 : f32
    "tpu.trace_stop"() : () -> ()
    %75 = vector.shape_cast %12 : vector<1x16xi1> to vector<1x16xi1>
    %76 = vector.broadcast %75 : vector<1x16xi1> to vector<16x16xi1>
    %77 = vector.broadcast %cst_36 : f32 to vector<16x16xf32>
    %78 = arith.select %76, %74, %77 : vector<16x16xi1>, vector<16x16xf32>
    %cst_37 = arith.constant dense<0xFF800000> : vector<16xf32>
    %79 = vector.multi_reduction <maximumf>, %78, %cst_37 [1] : vector<16x16xf32> to vector<16xf32>
    %80 = vector.shape_cast %79 : vector<16xf32> to vector<16x1xf32>
    %81 = vector.broadcast %80 : vector<16x1xf32> to vector<16x16xf32>
    %82 = arith.subf %78, %81 : vector<16x16xf32>
    %83 = math.exp %82 : vector<16x16xf32>
    %cst_38 = arith.constant dense<0.000000e+00> : vector<16xf32>
    %84 = vector.multi_reduction <add>, %83, %cst_38 [1] : vector<16x16xf32> to vector<16xf32>
    %85 = vector.shape_cast %84 : vector<16xf32> to vector<16x1xf32>
    %86 = tpu.reciprocal %85 {approx = true} : vector<16x1xf32> -> vector<16x1xf32>
    %87 = vector.broadcast %86 : vector<16x1xf32> to vector<16x16xf32>
    %88 = arith.mulf %83, %87 : vector<16x16xf32>
    %89 = arith.truncf %88 : vector<16x16xf32> to vector<16x16xbf16>
    %cst_39 = arith.constant dense<0.000000e+00> : vector<16x32xf32>
    %90 = tpu.matmul %89, %73, %cst_39 {dimension_numbers = #tpu.dot_dimension_numbers<[1], [0], [0], [1], [0, 0, 1, 1], [], []>} : vector<16x16xbf16>, vector<16x32xbf16>, vector<16x32xf32> -> vector<16x32xf32>
    %91 = vector.extract_strided_slice %28 {offsets = [0, 96], sizes = [16, 32], strides = [1, 1]} : vector<16x128xbf16> to vector<16x32xbf16>
    %92 = vector.extract_strided_slice %29 {offsets = [0, 96], sizes = [16, 32], strides = [1, 1]} : vector<16x128xbf16> to vector<16x32xbf16>
    %93 = vector.extract_strided_slice %30 {offsets = [0, 96], sizes = [16, 32], strides = [1, 1]} : vector<16x128xbf16> to vector<16x32xbf16>
    "tpu.trace_start"() <{level = 10 : i32, message = "qd,kd->qk"}> : () -> ()
    %cst_40 = arith.constant dense<0.000000e+00> : vector<16x16xf32>
    %94 = tpu.matmul %91, %92, %cst_40 {dimension_numbers = #tpu.dot_dimension_numbers<[1], [1], [0], [0], [0, 0, 1, 0], [], []>} : vector<16x32xbf16>, vector<16x32xbf16>, vector<16x16xf32> -> vector<16x16xf32>
    %cst_41 = arith.constant -1.000000e+09 : f32
    "tpu.trace_stop"() : () -> ()
    %95 = vector.shape_cast %12 : vector<1x16xi1> to vector<1x16xi1>
    %96 = vector.broadcast %95 : vector<1x16xi1> to vector<16x16xi1>
    %97 = vector.broadcast %cst_41 : f32 to vector<16x16xf32>
    %98 = arith.select %96, %94, %97 : vector<16x16xi1>, vector<16x16xf32>
    %cst_42 = arith.constant dense<0xFF800000> : vector<16xf32>
    %99 = vector.multi_reduction <maximumf>, %98, %cst_42 [1] : vector<16x16xf32> to vector<16xf32>
    %100 = vector.shape_cast %99 : vector<16xf32> to vector<16x1xf32>
    %101 = vector.broadcast %100 : vector<16x1xf32> to vector<16x16xf32>
    %102 = arith.subf %98, %101 : vector<16x16xf32>
    %103 = math.exp %102 : vector<16x16xf32>
    %cst_43 = arith.constant dense<0.000000e+00> : vector<16xf32>
    %104 = vector.multi_reduction <add>, %103, %cst_43 [1] : vector<16x16xf32> to vector<16xf32>
    %105 = vector.shape_cast %104 : vector<16xf32> to vector<16x1xf32>
    %106 = tpu.reciprocal %105 {approx = true} : vector<16x1xf32> -> vector<16x1xf32>
    %107 = vector.broadcast %106 : vector<16x1xf32> to vector<16x16xf32>
    %108 = arith.mulf %103, %107 : vector<16x16xf32>
    %109 = arith.truncf %108 : vector<16x16xf32> to vector<16x16xbf16>
    %cst_44 = arith.constant dense<0.000000e+00> : vector<16x32xf32>
    %110 = tpu.matmul %109, %93, %cst_44 {dimension_numbers = #tpu.dot_dimension_numbers<[1], [0], [0], [1], [0, 0, 1, 1], [], []>} : vector<16x16xbf16>, vector<16x32xbf16>, vector<16x32xf32> -> vector<16x32xf32>
    %111 = tpu.concatenate %50, %70, %90, %110 in 1 : vector<16x32xf32>, vector<16x32xf32>, vector<16x32xf32>, vector<16x32xf32> -> vector<16x128xf32>
    %112 = arith.truncf %111 : vector<16x128xf32> to vector<16x128xbf16>
    %c0_45 = arith.constant 0 : index
    %c0_46 = arith.constant 0 : index
    %113 = vector.load %arg12[%c0_45, %c0_46] : memref<128x128xbf16, #tpu.memory_space<vmem>>, vector<128x128xbf16>
    %cst_47 = arith.constant dense<0.000000e+00> : vector<16x128xf32>
    %114 = tpu.matmul %112, %113, %cst_47 {dimension_numbers = #tpu.dot_dimension_numbers<[1], [0], [0], [1], [0, 0, 1, 1], [], []>} : vector<16x128xbf16>, vector<128x128xbf16>, vector<16x128xf32> -> vector<16x128xf32>
    %c0_48 = arith.constant 0 : index
    %c0_49 = arith.constant 0 : index
    %115 = vector.load %arg13[%c0_48, %c0_49] : memref<1x128xf32, #tpu.memory_space<vmem>>, vector<1x128xf32>
    %116 = vector.broadcast %115 : vector<1x128xf32> to vector<16x128xf32>
    %117 = arith.addf %114, %116 : vector<16x128xf32>
    %c0_50 = arith.constant 0 : index
    %c0_51 = arith.constant 0 : index
    %c0_52 = arith.constant 0 : index
    %118 = vector.load %arg14[%c0_50, %c0_51, %c0_52] : memref<1x16x128xf32, #tpu.memory_space<vmem>>, vector<1x16x128xf32>
    %119 = vector.shape_cast %118 : vector<1x16x128xf32> to vector<16x128xf32>
    %120 = vector.shape_cast %117 : vector<16x128xf32> to vector<1x16x128xf32>
    tpu.vector_store %arg14[%c0_50, %c0_51, %c0_52], %120 {strides = array<i32>} : memref<1x16x128xf32, #tpu.memory_space<vmem>>, vector<1x16x128xf32>,
    return
  }
  func.func @transform_0(%arg0: i32, %arg1: i32) -> (i32, i32, i32) {
    %c0_i32 = arith.constant 0 : i32
    %c0_i32_0 = arith.constant 0 : i32
    return %arg0, %arg1, %c0_i32 : i32, i32, i32
  }
  func.func @transform_1(%arg0: i32, %arg1: i32) -> (i32, i32, i32) {
    %c0_i32 = arith.constant 0 : i32
    %c0_i32_0 = arith.constant 0 : i32
    %c0_i32_1 = arith.constant 0 : i32
    return %arg0, %c0_i32, %c0_i32_0 : i32, i32, i32
  }
  func.func @transform_2(%arg0: i32, %arg1: i32) -> (i32, i32, i32) {
    %c0_i32 = arith.constant 0 : i32
    %c0_i32_0 = arith.constant 0 : i32
    %c0_i32_1 = arith.constant 0 : i32
    return %arg0, %c0_i32, %c0_i32_0 : i32, i32, i32
  }
  func.func @transform_3(%arg0: i32, %arg1: i32) -> (i32, i32, i32) {
    %c0_i32 = arith.constant 0 : i32
    %c0_i32_0 = arith.constant 0 : i32
    %c0_i32_1 = arith.constant 0 : i32
    return %arg0, %c0_i32, %c0_i32_0 : i32, i32, i32
  }
  func.func @transform_4(%arg0: i32, %arg1: i32) -> (i32, i32) {
    %c0_i32 = arith.constant 0 : i32
    %c0_i32_0 = arith.constant 0 : i32
    %c0_i32_1 = arith.constant 0 : i32
    return %c0_i32, %c0_i32_0 : i32, i32
  }
  func.func @transform_5(%arg0: i32, %arg1: i32) -> (i32, i32) {
    %c0_i32 = arith.constant 0 : i32
    %c0_i32_0 = arith.constant 0 : i32
    %c0_i32_1 = arith.constant 0 : i32
    return %c0_i32, %c0_i32_0 : i32, i32
  }
  func.func @transform_6(%arg0: i32, %arg1: i32) -> (i32, i32) {
    %c0_i32 = arith.constant 0 : i32
    %c0_i32_0 = arith.constant 0 : i32
    %c0_i32_1 = arith.constant 0 : i32
    return %c0_i32, %c0_i32_0 : i32, i32
  }
  func.func @transform_7(%arg0: i32, %arg1: i32) -> (i32, i32) {
    %c0_i32 = arith.constant 0 : i32
    %c0_i32_0 = arith.constant 0 : i32
    %c0_i32_1 = arith.constant 0 : i32
    return %c0_i32, %c0_i32_0 : i32, i32
  }
  func.func @transform_8(%arg0: i32, %arg1: i32) -> (i32, i32) {
    %c0_i32 = arith.constant 0 : i32
    %c0_i32_0 = arith.constant 0 : i32
    %c0_i32_1 = arith.constant 0 : i32
    return %c0_i32, %c0_i32_0 : i32, i32
  }
  func.func @transform_9(%arg0: i32, %arg1: i32) -> (i32, i32) {
    %c0_i32 = arith.constant 0 : i32
    %c0_i32_0 = arith.constant 0 : i32
    %c0_i32_1 = arith.constant 0 : i32
    return %c0_i32, %c0_i32_0 : i32, i32
  }
  func.func @transform_10(%arg0: i32, %arg1: i32) -> (i32, i32) {
    %c0_i32 = arith.constant 0 : i32
    %c0_i32_0 = arith.constant 0 : i32
    %c0_i32_1 = arith.constant 0 : i32
    return %c0_i32, %c0_i32_0 : i32, i32
  }
  func.func @transform_11(%arg0: i32, %arg1: i32) -> (i32, i32) {
    %c0_i32 = arith.constant 0 : i32
    %c0_i32_0 = arith.constant 0 : i32
    %c0_i32_1 = arith.constant 0 : i32
    return %c0_i32, %c0_i32_0 : i32, i32
  }
  func.func @transform_12(%arg0: i32, %arg1: i32) -> (i32, i32, i32) {
    %c0_i32 = arith.constant 0 : i32
    %c0_i32_0 = arith.constant 0 : i32
    return %arg0, %arg1, %c0_i32 : i32, i32, i32
  }
}

</mosaic_0001>

<bundles_post_ra>
// kernel: tpu_custom_call.1
= control target key start
LH: loop header
LB: loop body
LE: loop exit
PB: predicated region body
PF: predicated region fallthrough
CT: control target
= control target key end

     0   :  { %s3664_s0 = inlined_call_operand.hbm [shape: f32[2,16,128], index: 0, kind: input, shape index: {}]   ;;  %s3665_s1 = inlined_call_operand.hbm [shape: f32[2,16,128], index: 1, kind: input, shape index: {}]   ;;  %s3666_s2 = inlined_call_operand.hbm [shape: f32[2,16,128], index: 2, kind: input, shape index: {}]   ;;  %s3667_s3 = inlined_call_operand.hbm [shape: s32[2,1,16], index: 3, kind: input, shape index: {}]   ;;  %s3668_s4 = inlined_call_operand.hbm [shape: bf16[128,128], index: 4, kind: input, shape index: {}]   ;;  %s3669_s5 = inlined_call_operand.hbm [shape: f32[1,128], index: 5, kind: input, shape index: {}]   ;;  %s3670_s6 = inlined_call_operand.hbm [shape: bf16[128,128], index: 6, kind: input, shape index: {}]   ;;  %s3671_s7 = inlined_call_operand.hbm [shape: f32[1,128], index: 7, kind: input, shape index: {}]   ;;  %s3672_s8 = inlined_call_operand.hbm [shape: bf16[128,128], index: 8, kind: input, shape index: {}]   ;;  %s3673_s9 = inlined_call_operand.hbm [shape: f32[1,128], index: 9, kind: input, shape index: {}]   ;;  %s3674_s10 = inlined_call_operand.hbm [shape: bf16[128,128], index: 10, kind: input, shape index: {}]   ;;  %s3675_s11 = inlined_call_operand.hbm [shape: f32[1,128], index: 11, kind: input, shape index: {}]   ;;  %s3676_s12 = inlined_call_operand.hbm [shape: f32[2,16,128], index: 12, kind: output, shape index: {}]  }
   0x1   :  { %3712 = sst [smem:[#allocation41_spill]] %s3664_s0 }
   0x2   :  { %3713 = sst [smem:[#allocation42_spill]] %s3665_s1 }
   0x3   :  { %3714 = sst [smem:[#allocation43_spill]] %s3666_s2 }
   0x4   :  { %3715 = sst [smem:[#allocation44_spill]] %s3667_s3 }
   0x5   :  { %3716 = sst [smem:[#allocation45_spill]] %s3668_s4 }
   0x6   :  { %3717 = sst [smem:[#allocation46_spill]] %s3669_s5 }
   0x7   :  { %3718 = sst [smem:[#allocation47_spill]] %s3671_s7 }
   0x8   :  { %3719 = sst [smem:[#allocation48_spill]] %s3673_s9 }
   0x9   :  { %3720 = sst [smem:[#allocation49_spill]] %s3676_s12 }
   0xa   :  { %17 = vsyncpa [#allocation3], 0 }
   0xb   :  { %19 = vsyncpa [#allocation3 + $0x1], 0 }
   0xc   :  { %20 = vsyncpa [#allocation6], 0 }
   0xd   :  { %22 = vsyncpa [#allocation6 + $0x1], 0 }
   0xe   :  { %23 = vsyncpa [#allocation9], 0 }
   0xf   :  { %25 = vsyncpa [#allocation9 + $0x1], 0 }
  0x10   :  { %26 = vsyncpa [#allocation12], 0 }
  0x11   :  { %27 = vsyncpa [#allocation15], 0 }
  0x12   :  { %28 = vsyncpa [#allocation18], 0 }
  0x13   :  { %29 = vsyncpa [#allocation21], 0 }
  0x14   :  { %30 = vsyncpa [#allocation4], 0 }
  0x15   :  { %32 = vsyncpa [#allocation4 + $0x1], 0  ;;  %s2970_s21 = smov 0   ;;  %s2972_s22 = smov 0  }
  0x16   :  { %s2974_s23 = smov 0   ;;  %s2976_s24 = smov 0  }
  0x17   :  { %s2978_s25 = smov 0   ;;  %s2980_s26 = smov 0  }
  0x18 LB: > { %3721 = sst [smem:[#allocation32_spill]] %s2858_s21  ;;  %s3001_s27 = sadd.s32 4294967295, %s2878_s26   ;;  %s2878_s26 = sphi %s2980_s26, %s38_s26   ;;  %s2874_s25 = sphi %s2978_s25, %s3787_s25   ;;  %s2870_s24 = sphi %s2976_s24, %s3786_s24   ;;  %s2866_s23 = sphi %s2974_s23, %s3782_s23   ;;  %s2862_s22 = sphi %s2972_s22, %s3785_s22   ;;  %s2858_s21 = sphi %s2970_s21, %s3784_s21  }
  0x19   : > { %3722 = sst [smem:[#allocation33_spill]] %s2866_s23  ;;  %p1909_p0 = scmp.ge.s32.totalorder %s2878_s26, 1 }
  0x1a   : > { %3723 = sst [smem:[#allocation34_spill]] %s2870_s24  ;;  %p3682_p1 = scmp.eq.s32.totalorder %s3001_s27, 0 }
  0x1b   : > { %3724 = sst [smem:[#allocation35_spill]] %s3001_s27  ;;  %p357_p2 = scmp.lt.s32.totalorder %s2878_s26, 3 }
  0x1c   : > { %s2880_s29 = smov [#allocation10]   ;;  %s2881_s14 = smov [#allocation11]  }
  0x1d   : > { %p3006_p3 = pnand %p1909_p0, %p357_p2  ;;  %s369_s30 = sshll.u32 %s2880_s29, 4  ;;  %s3010_s30 = int_to_ptr.vmem [resolvable:$true] %s369_s30 }
  0x1e   : > { %s383_s15 = sshll.u32 %s2881_s14, 4  ;;  %s2882_s16 = smov [#allocation14]   ;;  %s3021_s15 = int_to_ptr.vmem [resolvable:$true] %s383_s15 }
  0x1f   : > { %s3725_s28 = scalar_select %p3006_p3, 1, 0 }
  0x20   : > { %p2217_p4 = pneg %p3006_p3  ;;  %s3023_s17 = sshll.u32 %s2882_s16, 4  ;;  %s408_s17 = int_to_ptr.vmem [resolvable:$true] %s3023_s17 }
  0x21   : > { %3726 = sst [smem:[#allocation36_spill]] %s3725_s28  ;;  %s3728_s4 = sld [smem:[#allocation45_spill]] }
  0x22   : > { %p3017_p6 = pnand %p2217_p4, %p3682_p1 }
  0x24   : > { %s3727_s13 = scalar_select %p3017_p6, 1, 0 }
  0x25   : > { %p3033_p8 = pneg %p3017_p6 }
  0x27   : > { %s2424_s20 = scalar_lea.hbm %s3728_s4, 1024 }
  0x28   : > { %p2425_p7 = scmp.ne.s32.totalorder %s3728_s4, %s2424_s20  ;;  %p2431_p11 = scmp.lt.u32.totalorder %s2424_s20, %s3728_s4 }
  0x29   : > { %s3729_s24 = scalar_select %p3033_p8, 1, 0 }
  0x2a   : > { %p2427_p9 = pnand %p3033_p8, %p2425_p7 }
  0x2c   : > { %p2428_p10 = pneg %p2427_p9 }
  0x2e   : > { %p2433_p12 = pnand %p2431_p11, %p2428_p10 }
  0x30   : > { %2436 = shalt.err (!%p2433_p12)
}
  0x31   : > { %s2437_s12 = scalar_lea.vmem %s3010_s30, 1024  ;;  %p2445_p4 = scmp.lt.s32.totalorder %s3010_s30, %s3010_s30 }
  0x32   : > { %p2438_p13 = scmp.ne.s32.totalorder %s3010_s30, %s2437_s12  ;;  %p2446_p5 = scmp.lt.s32.totalorder %s2437_s12, %s2437_s12 }
  0x34   : > { %p2440_p0 = pnand %p2438_p13, %p3033_p8  ;;  %p2447_p7 = por %p2446_p5, %p2445_p4 }
  0x36   : > { %p2441_p2 = pneg %p2440_p0 }
  0x38   : > { %p2448_p9 = pnand %p2447_p7, %p2441_p2 }
  0x3a   : > { %2451 = shalt.err (!%p2448_p9)
}
  0x3b   : > { %s3684_s18 = smov 64   ;;  %s3686_s19 = smov 4  }
  0x3c   : > { %2220 = dma.hbm_to_vmem [thread:$0]  (!%p3017_p6), %s3728_s4, 1024, %s3010_s30, [#allocation9], %s3684_s18, %s3684_s18, %s3686_s19  }
  0x3d   : > { %s3730_s5 = sld [smem:[#allocation46_spill]] }
  0x43   : > { %s2452_s12 = scalar_lea.hbm %s3730_s5, 16 }
  0x44   : > { %p2453_p5 = scmp.ne.s32.totalorder %s3730_s5, %s2452_s12  ;;  %p2459_p12 = scmp.lt.u32.totalorder %s2452_s12, %s3730_s5 }
  0x46   : > { %p2455_p10 = pnand %p2453_p5, %p3033_p8 }
  0x48   : > { %p2456_p11 = pneg %p2455_p10 }
  0x4a   : > { %p2461_p13 = pnand %p2459_p12, %p2456_p11 }
  0x4c   : > { %2464 = shalt.err (!%p2461_p13)
}
  0x4d   : > { %s2465_s30 = scalar_lea.vmem %s3021_s15, 16  ;;  %s2472_s3 = scalar_lea.vmem %s3021_s15, 32 }
  0x4e   : > { %p2466_p0 = scmp.ne.s32.totalorder %s3021_s15, %s2465_s30  ;;  %p2473_p7 = scmp.lt.s32.totalorder %s3021_s15, %s3021_s15 }
  0x4f   : > { %p2474_p9 = scmp.lt.s32.totalorder %s2472_s3, %s2465_s30 }
  0x50   : > { %p2468_p2 = pnand %p2466_p0, %p3033_p8 }
  0x51   : > { %p2475_p5 = por %p2474_p9, %p2473_p7 }
  0x52   : > { %p2469_p4 = pneg %p2468_p2 }
  0x54   : > { %p2476_p10 = pnand %p2475_p5, %p2469_p4 }
  0x56   : > { %2479 = shalt.err (!%p2476_p10)
}
  0x57   : > { %2223 = dma.hbm_to_vmem [thread:$0]  (!%p3017_p6), %s3730_s5, 16, %s3021_s15, [#allocation12]  }
  0x58   : > { %s3731_s7 = sld [smem:[#allocation47_spill]] }
  0x5e   : > { %s2480_s29 = scalar_lea.hbm %s3731_s7, 16 }
  0x5f   : > { %p2481_p11 = scmp.ne.s32.totalorder %s3731_s7, %s2480_s29  ;;  %p2487_p0 = scmp.lt.u32.totalorder %s2480_s29, %s3731_s7 }
  0x61   : > { %p2483_p12 = pnand %p2481_p11, %p3033_p8 }
  0x63   : > { %p2484_p13 = pneg %p2483_p12 }
  0x65   : > { %p2489_p2 = pnand %p2487_p0, %p2484_p13 }
  0x67   : > { %2492 = shalt.err (!%p2489_p2)
}
  0x68   : > { %s2493_s3 = scalar_lea.vmem %s408_s17, 16  ;;  %s2500_s15 = scalar_lea.vmem %s408_s17, 32 }
  0x69   : > { %p2494_p4 = scmp.ne.s32.totalorder %s408_s17, %s2493_s3  ;;  %p2501_p5 = scmp.lt.s32.totalorder %s408_s17, %s408_s17 }
  0x6a   : > { %p2502_p10 = scmp.lt.s32.totalorder %s2500_s15, %s2493_s3 }
  0x6b   : > { %p2496_p7 = pnand %p2494_p4, %p3033_p8 }
  0x6c   : > { %p2503_p1 = por %p2502_p10, %p2501_p5 }
  0x6d   : > { %p2497_p9 = pneg %p2496_p7 }
  0x6f   : > { %p2504_p3 = pnand %p2503_p1, %p2497_p9 }
  0x71   : > { %2507 = shalt.err (!%p2504_p3)
}
  0x72   : > { %2229 = dma.hbm_to_vmem [thread:$0]  (!%p3017_p6), %s3731_s7, 16, %s408_s17, [#allocation15]  }
  0x73   : > { %s2885_s28 = smov [#allocation17]   ;;  %s3732_s9 = sld [smem:[#allocation48_spill]] }
  0x74   : > { %s431_s20 = sshll.u32 %s2885_s28, 4  ;;  %s432_s20 = int_to_ptr.vmem [resolvable:$true] %s431_s20 }
  0x79   : > { %s2508_s16 = scalar_lea.hbm %s3732_s9, 16 }
  0x7a   : > { %p2509_p11 = scmp.ne.s32.totalorder %s3732_s9, %s2508_s16  ;;  %p2515_p12 = scmp.lt.u32.totalorder %s2508_s16, %s3732_s9 }
  0x7c   : > { %p2511_p1 = pnand %p2509_p11, %p3033_p8 }
  0x7e   : > { %p2512_p3 = pneg %p2511_p1 }
  0x80   : > { %p2517_p13 = pnand %p2515_p12, %p2512_p3 }
  0x82   : > { %2520 = shalt.err (!%p2517_p13)
}
  0x83   : > { %s2521_s17 = scalar_lea.vmem %s432_s20, 16  ;;  %s2528_s0 = scalar_lea.vmem %s432_s20, 32 }
  0x84   : > { %p2522_p0 = scmp.ne.s32.totalorder %s432_s20, %s2521_s17  ;;  %p2529_p7 = scmp.lt.s32.totalorder %s432_s20, %s432_s20 }
  0x85   : > { %p2530_p9 = scmp.lt.s32.totalorder %s2528_s0, %s2521_s17 }
  0x86   : > { %p2524_p2 = pnand %p2522_p0, %p3033_p8 }
  0x87   : > { %p2531_p5 = por %p2530_p9, %p2529_p7 }
  0x88   : > { %p2525_p4 = pneg %p2524_p2 }
  0x8a   : > { %p2532_p10 = pnand %p2531_p5, %p2525_p4 }
  0x8c   : > { %2535 = shalt.err (!%p2532_p10)
}
  0x8d   : > { %2235 = dma.hbm_to_vmem [thread:$0]  (!%p3017_p6), %s3732_s9, 16, %s432_s20, [#allocation18]  }
  0x8e   : > { %s1908_s29 = sadd.s32 4294967294, %s2878_s26   ;;  %s50_s14 = sadd.s32 1, %s2874_s25 }
  0x8f   : > { %p52_p11 = scmp.ge.s32.totalorder %s50_s14, 2  ;;  %s59_s16 = sadd.s32 1, %s2866_s23 }
  0x90   : > { %p66_p1 = scmp.ne.s32.totalorder %s2866_s23, %s2862_s22  ;;  %p67_p3 = scmp.eq.s32.totalorder %s2878_s26, 0 }
  0x91   : > { %s3789_s14 = smov (%p52_p11, %s50_s14), 0  ;;  %p72_p13 = scmp.ne.s32.totalorder %s2862_s22, %s2858_s21 }
  0x92   : > { %3733 = sst [smem:[#allocation37_spill]] %s3789_s14  ;;  %p3126_p12 = por %p67_p3, %p66_p1 }
  0x93   : > { %s54_s20 = ssub.s32 %s2874_s25, %s3789_s14  ;;  %p344_p0 = scmp.eq.s32.totalorder %s3001_s27, 1 }
  0x94   : > { %p57_p2 = scmp.eq.s32.totalorder %s54_s20, 0  ;;  %p3735_p4 = scmp.eq.s32.totalorder %s3001_s27, 0 }
  0x95   : > { %p3141_p9 = por %p344_p0, %p66_p1  ;;  %p350_p5 = scmp.eq.s32.totalorder %s1908_s29, 1 }
  0x96   : > { %p3137_p7 = por %p3735_p4, %p72_p13  ;;  %p2267_p11 = scmp.lt.s32.totalorder %s2878_s26, 2 }
  0x97   : > { %s3737_s3 = scalar_select %p3141_p9, 1, 0 }
  0x98   : > { %s3736_s30 = scalar_select %p3137_p7, 1, 0 }
  0x99   : > { %3738 = sst [smem:[#allocation38_spill]] %s3737_s3  ;;  %p3148_p10 = por %p350_p5, %p72_p13 }
  0x9a   : > { %s3146_s15 = scalar_select %p57_p2, %s2866_s23, %s59_s16  }
  0x9b   : > { %s3740_s17 = scalar_select %p3148_p10, 1, 0 }
  0x9c   : > { %3739 = sst [smem:[#allocation39_spill]] %s3146_s15  ;;  %s3154_s0 = sand.u32 1, %s2866_s23  }
  0x9d   : > { %3741 = sst [smem:[#allocation40_spill]] %s3740_s17  ;;  %s3157_s2 = sshll.u32 %s2874_s25, 8 }
  0x9e   : > { %s3160_s28 = sshll.u32 %s3154_s0, 4  ;;  %p3164_p1 = pnand %p2267_p11, %p3126_p12 }
  0x9f   : > { %s3690_s29 = sand.u32 1, %s2878_s26   ;;  %s3743_s1 = sld [smem:[#allocation42_spill]] }
  0xa0   : > { %s3742_s20 = scalar_select %p3164_p1, 1, 0 }
  0xa1   : > { %s493_s4 = scalar_lea.vmem [#allocation5], %s3160_s28  ;;  %s3180_s12 = scalar_lea.sflag [#allocation6], %s3690_s29 }
  0xa2   : > { %s500_s5 = sshll.u32 %s493_s4, 4  ;;  %p3186_p12 = pneg %p3164_p1  ;;  %s3176_s5 = int_to_ptr.vmem [resolvable:$true] %s500_s5 }
  0xa4   : > { %s3744_s9 = scalar_select %p3186_p12, 1, 0 }
  0xa5   : > { %s3173_s19 = scalar_lea.hbm %s3743_s1, %s3157_s2  ;;  %s2541_s4 = scalar_lea.hbm %s3743_s1, 512 }
  0xa6   : > { %s2536_s7 = scalar_lea.hbm %s3173_s19, 256  ;;  %p2542_p2 = scmp.lt.u32.totalorder %s3173_s19, %s3743_s1 }
  0xa7   : > { %p2537_p3 = scmp.ne.s32.totalorder %s3173_s19, %s2536_s7  ;;  %p2543_p4 = scmp.lt.u32.totalorder %s2541_s4, %s2536_s7 }
  0xa8   : > { %p2545_p11 = scmp.lt.u32.totalorder %s2536_s7, %s3173_s19 }
  0xa9   : > { %p2539_p13 = pnand %p3186_p12, %p2537_p3  ;;  %p2544_p5 = por %p2543_p4, %p2542_p2 }
  0xab   : > { %p2540_p0 = pneg %p2539_p13  ;;  %p2546_p10 = por %p2545_p11, %p2544_p5 }
  0xad   : > { %p2547_p9 = pnand %p2546_p10, %p2540_p0 }
  0xaf   : > { %2550 = shalt.err (!%p2547_p9)
}
  0xb0   : > { %s2551_s29 = scalar_lea.vmem %s3176_s5, 256  ;;  %s2886_s18 = smov [#allocation5]  }
  0xb1   : > { %p2552_p3 = scmp.ne.s32.totalorder %s3176_s5, %s2551_s29  ;;  %s2556_s16 = sshll.u32 %s2886_s18, 4  ;;  %s2557_s16 = int_to_ptr.vmem [resolvable:$false] %s2556_s16 }
  0xb2   : > { %s2558_s14 = scalar_lea.vmem %s2557_s16, 512  ;;  %p2559_p6 = scmp.lt.s32.totalorder %s3176_s5, %s2557_s16 }
  0xb3   : > { %p2554_p13 = pnand %p2552_p3, %p3186_p12  ;;  %p2560_p8 = scmp.lt.s32.totalorder %s2558_s14, %s2551_s29 }
  0xb5   : > { %p2555_p7 = pneg %p2554_p13  ;;  %p2561_p2 = por %p2560_p8, %p2559_p6 }
  0xb7   : > { %p2562_p4 = pnand %p2561_p2, %p2555_p7 }
  0xb9   : > { %2565 = shalt.err (!%p2562_p4)
}
  0xba   : > { %s3707_s7 = smov 128   ;;  %s3709_s15 = smov 8  }
  0xbb   : > { %2248 = dma.hbm_to_vmem [thread:$0]  (!%p3164_p1), %s3173_s19, 256, %s3176_s5, %s3180_s12, %s3707_s7, %s3707_s7, %s3709_s15  }
  0xbc   : > { %s2889_s4 = smov [#allocation13]   ;;  %s2890_s16 = smov [#allocation16]  }
  0xbd   : > { %s393_s18 = sshll.u32 %s2889_s4, 4  ;;  %s417_s29 = sshll.u32 %s2890_s16, 4  ;;  %s394_s18 = int_to_ptr.vmem [resolvable:$true] %s393_s18  ;;  %s418_s29 = int_to_ptr.vmem [resolvable:$true] %s417_s29 }
  0xbe   : > { %s2566_s23 = scalar_lea.hbm %s3670_s6, 1024  ;;  %p3745_p8 = scmp.ne.s32.totalorder %s3729_s24, 0 }
  0xbf   : > { %p2567_p6 = scmp.ne.s32.totalorder %s3670_s6, %s2566_s23  ;;  %p2573_p10 = scmp.lt.u32.totalorder %s2566_s23, %s3670_s6 }
  0xc1   : > { %p2569_p7 = pnand %p2567_p6, %p3745_p8 }
  0xc3   : > { %p2570_p9 = pneg %p2569_p7 }
  0xc5   : > { %p2575_p0 = pnand %p2573_p10, %p2570_p9 }
  0xc7   : > { %2578 = shalt.err (!%p2575_p0)
}
  0xc8   : > { %s2579_s5 = scalar_lea.vmem %s394_s18, 1024  ;;  %p2587_p13 = scmp.lt.s32.totalorder %s394_s18, %s394_s18 }
  0xc9   : > { %p2580_p5 = scmp.ne.s32.totalorder %s394_s18, %s2579_s5  ;;  %p2588_p2 = scmp.lt.s32.totalorder %s2579_s5, %s2579_s5 }
  0xcb   : > { %p2582_p11 = pnand %p2580_p5, %p3745_p8  ;;  %p2589_p4 = por %p2588_p2, %p2587_p13 }
  0xcd   : > { %p2583_p3 = pneg %p2582_p11 }
  0xcf   : > { %p2590_p1 = pnand %p2589_p4, %p2583_p3 }
  0xd1   : > { %2593 = shalt.err (!%p2590_p1)
}
  0xd2   : > { %p3746_p6 = scmp.ne.s32.totalorder %s3727_s13, 0  ;;  %s3747_s1 = smov 4  }
  0xd3   : > { %s3748_s21 = smov 64   ;;  %s2594_s17 = scalar_lea.hbm %s3672_s8, 1024 }
  0xd4   : > { %2226 = dma.hbm_to_vmem [thread:$0]  (!%p3746_p6), %s3670_s6, 1024, %s394_s18, [#allocation12], %s3748_s21, %s3748_s21, %s3747_s1  }
  0xd5   : > { %p2595_p7 = scmp.ne.s32.totalorder %s3672_s8, %s2594_s17  ;;  %p2601_p10 = scmp.lt.u32.totalorder %s2594_s17, %s3672_s8 }
  0xd7   : > { %p2597_p1 = pnand %p2595_p7, %p3745_p8 }
  0xd9   : > { %p2598_p9 = pneg %p2597_p1 }
  0xdb   : > { %p2603_p0 = pnand %p2601_p10, %p2598_p9 }
  0xdd   : > { %2606 = shalt.err (!%p2603_p0)
}
  0xde   : > { %s2607_s27 = scalar_lea.vmem %s418_s29, 1024  ;;  %p2615_p13 = scmp.lt.s32.totalorder %s418_s29, %s418_s29 }
  0xdf   : > { %p2608_p5 = scmp.ne.s32.totalorder %s418_s29, %s2607_s27  ;;  %p2616_p2 = scmp.lt.s32.totalorder %s2607_s27, %s2607_s27 }
  0xe1   : > { %p2610_p11 = pnand %p2608_p5, %p3745_p8  ;;  %p2617_p4 = por %p2616_p2, %p2615_p13 }
  0xe3   : > { %p2611_p3 = pneg %p2610_p11 }
  0xe5   : > { %p2618_p12 = pnand %p2617_p4, %p2611_p3 }
  0xe7   : > { %2621 = shalt.err (!%p2618_p12)
}
  0xe8   : > { %2232 = dma.hbm_to_vmem [thread:$0]  (!%p3746_p6), %s3672_s8, 1024, %s418_s29, [#allocation15], %s3748_s21, %s3748_s21, %s3747_s1  }
  0xe9   : > { %s2891_s19 = smov [#allocation19]   ;;  %s2892_s17 = smov [#allocation20]  }
  0xea   : > { %s441_s3 = sshll.u32 %s2891_s19, 4  ;;  %s455_s4 = sshll.u32 %s2892_s17, 4  ;;  %s442_s3 = int_to_ptr.vmem [resolvable:$true] %s441_s3  ;;  %s456_s4 = int_to_ptr.vmem [resolvable:$true] %s455_s4 }
  0xeb   : > { %s2622_s5 = scalar_lea.hbm %s3674_s10, 1024 }
  0xec   : > { %p2623_p12 = scmp.ne.s32.totalorder %s3674_s10, %s2622_s5  ;;  %p2629_p9 = scmp.lt.u32.totalorder %s2622_s5, %s3674_s10 }
  0xee   : > { %p2625_p7 = pnand %p2623_p12, %p3745_p8 }
  0xf0   : > { %p2626_p1 = pneg %p2625_p7 }
  0xf2   : > { %p2631_p10 = pnand %p2629_p9, %p2626_p1 }
  0xf4   : > { %2634 = shalt.err (!%p2631_p10)
}
  0xf5   : > { %s2635_s29 = scalar_lea.vmem %s442_s3, 1024  ;;  %p2643_p3 = scmp.lt.s32.totalorder %s442_s3, %s442_s3 }
  0xf6   : > { %p2636_p0 = scmp.ne.s32.totalorder %s442_s3, %s2635_s29  ;;  %p2644_p13 = scmp.lt.s32.totalorder %s2635_s29, %s2635_s29 }
  0xf8   : > { %p2638_p5 = pnand %p2636_p0, %p3745_p8  ;;  %p2645_p2 = por %p2644_p13, %p2643_p3 }
  0xfa   : > { %p2639_p11 = pneg %p2638_p5 }
  0xfc   : > { %p2646_p4 = pnand %p2645_p2, %p2639_p11 }
  0xfe   : > { %2649 = shalt.err (!%p2646_p4)
}
  0xff   : > { %2238 = dma.hbm_to_vmem [thread:$0]  (!%p3746_p6), %s3674_s10, 1024, %s442_s3, [#allocation18], %s3748_s21, %s3748_s21, %s3747_s1  }
 0x100   : > { %s2650_s17 = scalar_lea.hbm %s3675_s11, 16 }
 0x101   : > { %p2651_p12 = scmp.ne.s32.totalorder %s3675_s11, %s2650_s17  ;;  %p2657_p9 = scmp.lt.u32.totalorder %s2650_s17, %s3675_s11 }
 0x103   : > { %p2653_p7 = pnand %p2651_p12, %p3745_p8 }
 0x105   : > { %p2654_p1 = pneg %p2653_p7 }
 0x107   : > { %p2659_p10 = pnand %p2657_p9, %p2654_p1 }
 0x109   : > { %2662 = shalt.err (!%p2659_p10)
}
 0x10a   : > { %s2663_s18 = scalar_lea.vmem %s456_s4, 16  ;;  %s2670_s1 = scalar_lea.vmem %s456_s4, 32 }
 0x10b   : > { %p2664_p0 = scmp.ne.s32.totalorder %s456_s4, %s2663_s18  ;;  %p2671_p3 = scmp.lt.s32.totalorder %s456_s4, %s456_s4 }
 0x10c   : > { %p2672_p13 = scmp.lt.s32.totalorder %s2670_s1, %s2663_s18 }
 0x10d   : > { %p2666_p5 = pnand %p2664_p0, %p3745_p8 }
 0x10e   : > { %p2673_p2 = por %p2672_p13, %p2671_p3 }
 0x10f   : > { %p2667_p11 = pneg %p2666_p5 }
 0x111   : > { %p2674_p4 = pnand %p2673_p2, %p2667_p11 }
 0x113   : > { %2677 = shalt.err (!%p2674_p4)
}
 0x114   : > { %2241 = dma.hbm_to_vmem [thread:$0]  (!%p3746_p6), %s3675_s11, 16, %s456_s4, [#allocation21]  }
 0x115   : > { %s3749_s7 = sld [smem:[#allocation41_spill]]  ;;  %s470_s23 = scalar_lea.vmem [#allocation2], %s3160_s28 }
 0x116   : > { %s479_s13 = sshll.u32 %s470_s23, 4  ;;  %s3750_s16 = sld [smem:[#allocation43_spill]]  ;;  %s3301_s13 = int_to_ptr.vmem [resolvable:$true] %s479_s13 }
 0x117   : > { %s467_s5 = scalar_lea.sflag [#allocation3], %s3154_s0  ;;  %p3751_p6 = scmp.ne.s32.totalorder %s3744_s9, 0 }
 0x11b   : > { %s3298_s15 = scalar_lea.hbm %s3749_s7, %s3157_s2  ;;  %s2683_s1 = scalar_lea.hbm %s3749_s7, 512 }
 0x11c   : > { %s3307_s14 = scalar_lea.hbm %s3750_s16, %s3157_s2  ;;  %s2678_s4 = scalar_lea.hbm %s3298_s15, 256 }
 0x11d   : > { %p2679_p8 = scmp.ne.s32.totalorder %s3298_s15, %s2678_s4  ;;  %p2684_p1 = scmp.lt.u32.totalorder %s3298_s15, %s3749_s7 }
 0x11e   : > { %p2685_p9 = scmp.lt.u32.totalorder %s2683_s1, %s2678_s4  ;;  %p2687_p0 = scmp.lt.u32.totalorder %s2678_s4, %s3298_s15 }
 0x11f   : > { %p2681_p12 = pnand %p2679_p8, %p3751_p6 }
 0x120   : > { %p2686_p10 = por %p2685_p9, %p2684_p1 }
 0x121   : > { %p2682_p7 = pneg %p2681_p12 }
 0x122   : > { %p2688_p5 = por %p2687_p0, %p2686_p10 }
 0x124   : > { %p2689_p11 = pnand %p2688_p5, %p2682_p7 }
 0x126   : > { %2692 = shalt.err (!%p2689_p11)
}
 0x127   : > { %s2693_s2 = scalar_lea.vmem %s3301_s13, 256  ;;  %s2893_s24 = smov [#allocation2]  }
 0x128   : > { %p2694_p3 = scmp.ne.s32.totalorder %s3301_s13, %s2693_s2  ;;  %s2698_s29 = sshll.u32 %s2893_s24, 4  ;;  %s2699_s29 = int_to_ptr.vmem [resolvable:$false] %s2698_s29 }
 0x129   : > { %s2700_s23 = scalar_lea.vmem %s2699_s29, 512  ;;  %p2701_p4 = scmp.lt.s32.totalorder %s3301_s13, %s2699_s29 }
 0x12a   : > { %p2696_p13 = pnand %p2694_p3, %p3751_p6  ;;  %p2702_p8 = scmp.lt.s32.totalorder %s2700_s23, %s2693_s2 }
 0x12c   : > { %p2697_p2 = pneg %p2696_p13  ;;  %p2703_p12 = por %p2702_p8, %p2701_p4 }
 0x12e   : > { %p2704_p1 = pnand %p2703_p12, %p2697_p2 }
 0x130   : > { %2707 = shalt.err (!%p2704_p1)
}
 0x131   : > { %p3752_p7 = scmp.ne.s32.totalorder %s3742_s20, 0  ;;  %s3753_s19 = smov 8  }
 0x132   : > { %s3754_s17 = smov 128   ;;  %s514_s4 = scalar_lea.vmem [#allocation7], %s3160_s28 }
 0x133   : > { %2245 = dma.hbm_to_vmem [thread:$0]  (!%p3752_p7), %s3298_s15, 256, %s3301_s13, %s467_s5, %s3754_s17, %s3754_s17, %s3753_s19  }
 0x134   : > { %s521_s27 = sshll.u32 %s514_s4, 4  ;;  %s2708_s18 = scalar_lea.hbm %s3307_s14, 256  ;;  %s3337_s27 = int_to_ptr.vmem [resolvable:$true] %s521_s27 }
 0x135   : > { %p2709_p9 = scmp.ne.s32.totalorder %s3307_s14, %s2708_s18  ;;  %s2713_s3 = scalar_lea.hbm %s3750_s16, 512 }
 0x136   : > { %p2714_p5 = scmp.lt.u32.totalorder %s3307_s14, %s3750_s16  ;;  %p2715_p11 = scmp.lt.u32.totalorder %s2713_s3, %s2708_s18 }
 0x137   : > { %p2711_p10 = pnand %p2709_p9, %p3751_p6  ;;  %p2717_p13 = scmp.lt.u32.totalorder %s2708_s18, %s3307_s14 }
 0x138   : > { %p2716_p3 = por %p2715_p11, %p2714_p5 }
 0x139   : > { %p2712_p0 = pneg %p2711_p10 }
 0x13a   : > { %p2718_p2 = por %p2717_p13, %p2716_p3 }
 0x13c   : > { %p2719_p4 = pnand %p2718_p2, %p2712_p0 }
 0x13e   : > { %2722 = shalt.err (!%p2719_p4)
}
 0x13f   : > { %s2723_s28 = scalar_lea.vmem %s3337_s27, 256  ;;  %s2894_s15 = smov [#allocation7]  }
 0x140   : > { %p2724_p8 = scmp.ne.s32.totalorder %s3337_s27, %s2723_s28  ;;  %s2728_s13 = sshll.u32 %s2894_s15, 4  ;;  %s2729_s13 = int_to_ptr.vmem [resolvable:$false] %s2728_s13 }
 0x141   : > { %s2730_s5 = scalar_lea.vmem %s2729_s13, 512  ;;  %p2731_p9 = scmp.lt.s32.totalorder %s3337_s27, %s2729_s13 }
 0x142   : > { %p2726_p12 = pnand %p2724_p8, %p3751_p6  ;;  %p2732_p10 = scmp.lt.s32.totalorder %s2730_s5, %s2723_s28 }
 0x144   : > { %p2727_p1 = pneg %p2726_p12  ;;  %p2733_p5 = por %p2732_p10, %p2731_p9 }
 0x146   : > { %p2734_p11 = pnand %p2733_p5, %p2727_p1 }
 0x148   : > { %2737 = shalt.err (!%p2734_p11)
}
 0x149   : > { %2251 = dma.hbm_to_vmem [thread:$0]  (!%p3752_p7), %s3307_s14, 256, %s3337_s27, %s3180_s12, %s3754_s17, %s3754_s17, %s3753_s19  }
 0x14a   : > { %s1928_s29 = sshll.u32 %s2874_s25, 4  ;;  %s534_s23 = scalar_lea.vmem [#allocation8], %s3154_s0 }
 0x14b   : > { %s541_s4 = sshll.u32 %s534_s23, 4  ;;  %s3755_s21 = sld [smem:[#allocation44_spill]]  ;;  %s542_s4 = int_to_ptr.vmem [resolvable:$true] %s541_s4 }
 0x14c   : > { %s3757_s24 = sand.u32 1, %s2878_s26  }
 0x14d   : > { %s532_s28 = scalar_lea.sflag [#allocation9], %s3757_s24 }
 0x151   : > { %s3756_s3 = smov %s3755_s21  ;;  %s3369_s2 = scalar_lea.hbm %s3755_s21, %s1928_s29 }
 0x152   : > { %s2738_s15 = scalar_lea.hbm %s3369_s2, 16  ;;  %s2743_s14 = scalar_lea.hbm %s3756_s3, 32 }
 0x153   : > { %p2739_p0 = scmp.ne.s32.totalorder %s3369_s2, %s2738_s15  ;;  %p2744_p2 = scmp.lt.u32.totalorder %s3369_s2, %s3756_s3 }
 0x154   : > { %p2745_p4 = scmp.lt.u32.totalorder %s2743_s14, %s2738_s15  ;;  %p2747_p12 = scmp.lt.u32.totalorder %s2738_s15, %s3369_s2 }
 0x155   : > { %p2741_p3 = pnand %p2739_p0, %p3751_p6 }
 0x156   : > { %p2746_p8 = por %p2745_p4, %p2744_p2 }
 0x157   : > { %p2742_p13 = pneg %p2741_p3 }
 0x158   : > { %p2748_p1 = por %p2747_p12, %p2746_p8 }
 0x15a   : > { %p2749_p9 = pnand %p2748_p1, %p2742_p13 }
 0x15c   : > { %2752 = shalt.err (!%p2749_p9)
}
 0x15d   : > { %s2753_s27 = scalar_lea.vmem %s542_s4, 16  ;;  %s2895_s13 = smov [#allocation8]  }
 0x15e   : > { %p2754_p10 = scmp.ne.s32.totalorder %s542_s4, %s2753_s27  ;;  %s2758_s5 = sshll.u32 %s2895_s13, 4  ;;  %s2759_s5 = int_to_ptr.vmem [resolvable:$false] %s2758_s5 }
 0x15f   : > { %s2760_s29 = scalar_lea.vmem %s2759_s5, 32  ;;  %p2761_p0 = scmp.lt.s32.totalorder %s542_s4, %s2759_s5 }
 0x160   : > { %p2756_p5 = pnand %p2754_p10, %p3751_p6  ;;  %p2762_p3 = scmp.lt.s32.totalorder %s2760_s29, %s2753_s27 }
 0x162   : > { %p2757_p11 = pneg %p2756_p5  ;;  %p2763_p7 = por %p2762_p3, %p2761_p0 }
 0x164   : > { %p2764_p2 = pnand %p2763_p7, %p2757_p11 }
 0x166   : > { %2767 = shalt.err (!%p2764_p2)
}
 0x167   : > { %p3758_p4 = scmp.ne.s32.totalorder %s3742_s20, 0  ;;  %s3759_s23 = sld [smem:[#allocation36_spill]] }
 0x169   : > { %2254 = dma.hbm_to_vmem [thread:$0]  (!%p3758_p4), %s3369_s2, 16, %s542_s4, %s532_s28  }
 0x16d   : > { %p3760_p13 = scmp.ne.s32.totalorder %s3759_s23, 0 }
 0x16e   : > { %s3393_s9 = sand.u32 (!%p3760_p13), 1, %s2862_s22   ;;  %p3761_p6 = scmp.ne.s32.totalorder (!%p3760_p13), %s3736_s30, 0 }
 0x16f   : > { %550 = sbr.rel (%p3760_p13) target bundleno = 3382 (0xd36), region = 68  ;;  %s3396_s18 = sshll.u32 (!%p3760_p13), %s3393_s9, 4 }
 0x170   : > { %s553_s1 = scalar_lea.sflag (!%p3760_p13), [#allocation3], %s3393_s9  ;;  %s556_s21 = scalar_lea.vmem (!%p3760_p13), [#allocation2], %s3396_s18 }
 0x176   : > { %2821 = dma.done.wait (%p3761_p6), %s553_s1, 256  }
 0x177   : > { %2823 = vsyncadd (%p3761_p6), %s553_s1, 4294967040  ;;  %s3762_s20 = sld [smem:[#allocation35_spill]]  ;;  %s565_s24 = scalar_lea.vmem [#allocation5], %s3396_s18 }
 0x17d   : > { %s561_s4 = sand.u32 1, %s3762_s20  }
 0x17e   : > { %s562_s2 = scalar_lea.sflag [#allocation6], %s561_s4 }
 0x17f   : > { %2825 = dma.done.wait (%p3761_p6), %s562_s2, 512  }
 0x180   : > { %2827 = vsyncadd (%p3761_p6), %s562_s2, 4294966784  ;;  %s574_s28 = scalar_lea.vmem [#allocation7], %s3396_s18  ;;  %s580_s15 = scalar_lea.sflag [#allocation9], %s561_s4 }
 0x181   : > { %s582_s12 = scalar_lea.vmem [#allocation8], %s3393_s9 }
 0x182   : > { %2829 = dma.done.wait (%p3761_p6), %s580_s15, 16  }
 0x183   : > { %2831 = vsyncadd (%p3761_p6), %s580_s15, 4294967280  ;;  %p3763_p7 = scmp.eq.s32.totalorder %s3762_s20, 0 }
 0x185   : > { %2833 = dma.done.wait (%p3763_p7), [#allocation9], 1024   ;;  %p3764_p8 = pmov %p3763_p7 }
 0x186   : > { %p3765_p12 = pmov %p3763_p7 }
 0x187   : > { %2835 = vsyncadd (%p3764_p8), [#allocation9], 4294966272 }
 0x188   : > { %2837 = dma.done.wait (%p3765_p12), [#allocation12], 1040   ;;  %p3766_p1 = pmov %p3763_p7 }
 0x18a   : > { %2839 = vsyncadd (%p3766_p1), [#allocation12], 4294966256  ;;  %p3767_p9 = pmov %p3766_p1 }
 0x18b   : > { %p3768_p10 = pmov %p3766_p1 }
 0x18c   : > { %2841 = dma.done.wait (%p3767_p9), [#allocation15], 1040  }
 0x18d   : > { %2843 = vsyncadd (%p3768_p10), [#allocation15], 4294966256  ;;  %p3769_p5 = pmov %p3766_p1 }
 0x18e   : > { %p3770_p11 = pmov %p3766_p1 }
 0x18f   : > { %2845 = dma.done.wait (%p3769_p5), [#allocation18], 1040  }
 0x190   : > { %2847 = vsyncadd (%p3770_p11), [#allocation18], 4294966256  ;;  %p3771_p0 = pmov %p3766_p1 }
 0x192   : > { %2849 = dma.done.wait (%p3771_p0), [#allocation21], 16   ;;  %p3772_p3 = pmov %p3771_p0 }
 0x193   : > { %v2896_v0 = vmov 0.0   ;;  %vm2897_vm0 = vmmov 0   ;;  %v2360_v1 = vld [vmem:[#allocation13] sm:$0xff]   ;;  %v2361_v2 = vld [vmem:[#allocation13 + $0x8] sm:$0xff]   ;;  %v2363_v5 = vld [vmem:[#allocation13 + $0x10] sm:$0xff]   ;;  %vm1022_vm1 = vcmask 261120   ;;  %v1071_v51 = vlaneseq }
 0x194   : > { %2851 = vsyncadd (%p3772_p3), [#allocation21], 4294967280  ;;  %2067 = vmatprep.subr.bf16.mxu1 %v2896_v0  ;;  %2047 = vmatprep.subr.bf16.mxu0 %v2896_v0  ;;  %v2362_v3 = vld [vmem:[#allocation10] sm:$0xff]   ;;  %v2364_v4 = vld [vmem:[#allocation10 + $0x8] sm:$0xff]   ;;  %v2898_v55 = vmov 0   ;;  %vm1078_vm4 = vcmask 130048  }
 0x195   : > { %2083 = vmatprep.mubr.msk.bf16.mxu1 %vm2897_vm0, %v2896_v0  ;;  %2063 = vmatprep.mubr.msk.bf16.mxu0 %vm2897_vm0, %v2896_v0  ;;  %v2366_v6 = vld [vmem:[#allocation10 + $0x10] sm:$0xff]   ;;  %v2365_v7 = vld [vmem:[#allocation13 + $0x18] sm:$0xff]   ;;  %v2367_v9 = vld [vmem:[#allocation13 + $0x20] sm:$0xff]   ;;  %v1072_v53 = vshrl.u32 %v1071_v51, 7  ;;  %s2899_s30 = smov 96   ;;  %s2900_s0 = smov 64  }
 0x196   : > { %2068 = vmatpush3.bf16.msra.mxu1 %v2360_v1  ;;  %2048 = vmatpush3.bf16.msra.mxu0 %v2362_v3  ;;  %v2368_v8 = vld [vmem:[#allocation10 + $0x18] sm:$0xff]   ;;  %v2370_v10 = vld [vmem:[#allocation10 + $0x20] sm:$0xff]   ;;  %v2369_v11 = vld [vmem:[#allocation13 + $0x28] sm:$0xff]   ;;  %s2901_s14 = smov 32   ;;  %vm1544_vm5 = vcmask 523264   ;;  %s3773_s19 = sld [smem:[#allocation34_spill]] }
 0x197   : > { %2069 = vmatprep.subr.bf16.mxu1 %v2896_v0  ;;  %2049 = vmatprep.subr.bf16.mxu0 %v2896_v0  ;;  %v2372_v12 = vld [vmem:[#allocation10 + $0x28] sm:$0xff]   ;;  %v2371_v13 = vld [vmem:[#allocation13 + $0x30] sm:$0xff]   ;;  %v2373_v15 = vld [vmem:[#allocation13 + $0x38] sm:$0xff]   ;;  %v1073_v54 = vsub.s32 0, %v1072_v53  ;;  %vm1547_vm6 = vcmask 785408   ;;  %s668_s17 = scalar_lea.vmem [#allocation22], %s3396_s18 }
 0x198   : > { %v2374_v14 = vld [vmem:[#allocation10 + $0x30] sm:$0xff]   ;;  %v2375_v18 = vld [vmem:[#allocation10 + $0x38] sm:$0xff]   ;;  %v1951_v23 = vld [vmem:[#allocation14] ss:$0 sm:$0xff]  ;;  %s3774_s27 = sld [smem:[#allocation38_spill]]  ;;  %s1681_s13 = sshll.u32 %s668_s17, 4  ;;  %s3610_s13 = int_to_ptr.vmem [resolvable:$true] %s1681_s13 }
 0x199   : > { %v675_v16 = vld [vmem:[%s565_s24] sm:$0xff]  ;;  %v676_v17 = vld [vmem:[%s565_s24 + $0x8] sm:$0xff]  ;;  %s3775_s1 = sld [smem:[#allocation49_spill]]  ;;  %s1666_s18 = scalar_lea.sflag [#allocation4], %s3393_s9 }
 0x19a   : > { %2070 = vmatpush3.bf16.msra.mxu1 %v2361_v2  ;;  %2050 = vmatpush3.bf16.msra.mxu0 %v2364_v4  ;;  %v672_v19 = vld [vmem:[%s556_s21] sm:$0xff]  ;;  %v673_v20 = vld [vmem:[%s556_s21 + $0x8] sm:$0xff]  ;;  %v677_v21 = vpack.c.bf16 %v676_v17, %v675_v16  ;;  %s2768_s20 = scalar_lea.vmem %s3610_s13, 256  ;;  %s2902_s4 = smov [#allocation22]  }
 0x19b   : > { %2071 = vmatprep.subr.bf16.mxu1 %v2896_v0  ;;  %2051 = vmatprep.subr.bf16.mxu0 %v2896_v0  ;;  %v674_v22 = vpack.c.bf16 %v673_v20, %v672_v19  ;;  %v1942_v25 = vld [vmem:[#allocation11] ss:$0 sm:$0xff]  ;;  %v2376_v40 = vld [vmem:[#allocation16] sm:$0xff]   ;;  %v2377_v41 = vld [vmem:[#allocation16 + $0x8] sm:$0xff]   ;;  %p2769_p2 = scmp.ne.s32.totalorder %s3610_s13, %s2768_s20  ;;  %s2772_s2 = sshll.u32 %s2902_s4, 4  ;;  %s2773_s2 = int_to_ptr.vmem [resolvable:$false] %s2772_s2 }
 0x19c   : > { %v2378_v42 = vld [vmem:[#allocation16 + $0x10] sm:$0xff]   ;;  %v2379_v43 = vld [vmem:[#allocation16 + $0x18] sm:$0xff]   ;;  %v2380_v44 = vld [vmem:[#allocation16 + $0x20] sm:$0xff]   ;;  %s1994_s5 = sshll.u32 %s3773_s19, 8  ;;  %s2774_s24 = scalar_lea.vmem %s2773_s2, 512 }
 0x19d   : > { %v2381_v45 = vld [vmem:[#allocation16 + $0x28] sm:$0xff]   ;;  %v2382_v46 = vld [vmem:[#allocation16 + $0x30] sm:$0xff]   ;;  %v2383_v47 = vld [vmem:[#allocation16 + $0x38] sm:$0xff]   ;;  %p2775_p7 = scmp.lt.s32.totalorder %s3610_s13, %s2773_s2  ;;  %p2776_p8 = scmp.lt.s32.totalorder %s2774_s24, %s2768_s20 }
 0x19e   : > { %2072 = vmatpush3.bf16.msra.mxu1 %v2363_v5  ;;  %2052 = vmatpush3.bf16.msra.mxu0 %v2366_v6  ;;  %v678_v48 = vld [vmem:[%s574_s28] sm:$0xff]  ;;  %v679_v49 = vld [vmem:[%s574_s28 + $0x8] sm:$0xff]  ;;  %p3776_p4 = scmp.ne.s32.totalorder %s3774_s27, 0 }
 0x19f   : > { %2073 = vmatprep.subr.bf16.mxu1 %v2896_v0  ;;  %2053 = vmatprep.subr.bf16.mxu0 %v2896_v0  ;;  %v680_v50 = vpack.c.bf16 %v679_v49, %v678_v48  ;;  %v681_v52 = vld [vmem:[%s582_s12] sm:$0x1]  ;;  %v1960_v16 = vld [vmem:[#allocation17] ss:$0 sm:$0xff]  ;;  %s3615_s21 = scalar_lea.hbm %s3775_s1, %s1994_s5  ;;  %p2777_p12 = por %p2776_p8, %p2775_p7 }
 0x1a0   : > { %vm682_vm2 = vcmp.ne.s32.totalorder %v681_v52, 0  ;;  %p2770_p13 = pnand %p2769_p2, %p3776_p4 }
 0x1a1   : > { %v1070_v56 = vsel %vm682_vm2, 1, %v2898_v55 }
 0x1a2   : > { %2074 = vmatpush3.bf16.msra.mxu1 %v2365_v7  ;;  %2054 = vmatpush3.bf16.msra.mxu0 %v2368_v8  ;;  %v3497_v57 = vrot.slane %v1070_v56, %v1073_v54  ;;  %p2771_p6 = pneg %p2770_p13 }
 0x1a3   : > { %2075 = vmatprep.subr.bf16.mxu1 %v2896_v0  ;;  %2055 = vmatprep.subr.bf16.mxu0 %v2896_v0 }
 0x1a4   : > { %vm1075_vm3 = vcmp.eq.s32.totalorder %v3497_v57, 1  ;;  %p2778_p1 = pnand %p2777_p12, %p2771_p6 }
 0x1a6   : > { %2076 = vmatpush3.bf16.msra.mxu1 %v2367_v9  ;;  %2056 = vmatpush3.bf16.msra.mxu0 %v2370_v10 }
 0x1a7   : > { %2077 = vmatprep.subr.bf16.mxu1 %v2896_v0  ;;  %2057 = vmatprep.subr.bf16.mxu0 %v2896_v0 }
 0x1aa   : > { %2078 = vmatpush3.bf16.msra.mxu1 %v2369_v11  ;;  %2058 = vmatpush3.bf16.msra.mxu0 %v2372_v12 }
 0x1ab   : > { %2079 = vmatprep.subr.bf16.mxu1 %v2896_v0  ;;  %2059 = vmatprep.subr.bf16.mxu0 %v2896_v0 }
 0x1ae   : > { %2080 = vmatpush3.bf16.msra.mxu1 %v2371_v13  ;;  %2060 = vmatpush3.bf16.msra.mxu0 %v2374_v14 }
 0x1af   : > { %2081 = vmatprep.subr.bf16.mxu1 %v2896_v0  ;;  %2061 = vmatprep.subr.bf16.mxu0 %v2896_v0 }
 0x1b2   : > { %2082 = vmatpush3.bf16.msra.mxu1 %v2373_v15  ;;  %2062 = vmatpush3.bf16.msra.mxu0 %v2375_v18 }
 0x1b3   : > { %2107 = vmatprep.subr.bf16.mxu1 %v2896_v0  ;;  %2087 = vmatprep.subr.bf16.mxu0 %v2896_v0 }
 0x1b5   : > { %2084 = vmatmul.mubr.bf16.vlgmr.msra.gmra.mrb[0].mxu1 %v677_v21  ;;  %2064 = vmatmul.mubr.bf16.vlgmr.msra.gmra.mrb[0].mxu0 %v674_v22 }
 0x1b6   : > { %2109 = vmatprep.mubr.msk.bf16.mxu1 %vm2897_vm0, %v2896_v0  ;;  %2103 = vmatprep.mubr.msk.bf16.mxu0 %vm2897_vm0, %v2896_v0 }
 0x1b7   : > { %2088 = vmatpush3.bf16.msra.mxu0 %v2376_v40 }
 0x1b8   : > { %2089 = vmatprep.subr.bf16.mxu0 %v2896_v0 }
 0x1bb   : > { %2090 = vmatpush3.bf16.msra.mxu0 %v2377_v41 }
 0x1bc   : > { %2091 = vmatprep.subr.bf16.mxu0 %v2896_v0 }
 0x1bf   : > { %2092 = vmatpush3.bf16.msra.mxu0 %v2378_v42 }
 0x1c0   : > { %2093 = vmatprep.subr.bf16.mxu0 %v2896_v0 }
 0x1c3   : > { %2094 = vmatpush3.bf16.msra.mxu0 %v2379_v43 }
 0x1c4   : > { %2095 = vmatprep.subr.bf16.mxu0 %v2896_v0 }
 0x1c7   : > { %2096 = vmatpush3.bf16.msra.mxu0 %v2380_v44 }
 0x1c8   : > { %2097 = vmatprep.subr.bf16.mxu0 %v2896_v0 }
 0x1cb   : > { %2098 = vmatpush3.bf16.msra.mxu0 %v2381_v45 }
 0x1cc   : > { %2099 = vmatprep.subr.bf16.mxu0 %v2896_v0 }
 0x1cf   : > { %2100 = vmatpush3.bf16.msra.mxu0 %v2382_v46 }
 0x1d0   : > { %2101 = vmatprep.subr.bf16.mxu0 %v2896_v0 }
 0x1d3   : > { %2102 = vmatpush3.bf16.msra.mxu0 %v2383_v47 }
 0x1d4   : > { %2155 = vmatprep.subr.bf16.mxu0 %v2896_v0 }
 0x1d6   : > { %2104 = vmatmul.mubr.bf16.vlgmr.msra.gmra.mrb[4].mxu0 %v680_v50 }
 0x1d7   : > { %2171 = vmatprep.mubr.msk.bf16.mxu0 %vm2897_vm0, %v2896_v0 }
 0x288   : > { %v900_v24 = vpop.f32.mrb[0].mxu1  ;;  %v788_v28 = vpop.f32.mrb[0].mxu0 }
 0x289   : > { %v2085_v26 = vpop.f32.mrb[1].mxu1  ;;  %v901_v29 = vadd.f32 %v1951_v23, %v900_v24  ;;  %v789_v32 = vadd.f32 %v1942_v25, %v788_v28  ;;  %v2065_v33 = vpop.f32.mrb[1].mxu0 }
 0x28a   : > { %v903_v27 = vpop.f32.mrb[2].mxu1  ;;  %v791_v34 = vpop.f32.mrb[2].mxu0 }
 0x28b   : > { %v904_v30 = vadd.f32 %v1951_v23, %v903_v27  ;;  %v2086_v31 = vpop.f32.mrb[3].mxu1  ;;  %v792_v36 = vadd.f32 %v1942_v25, %v791_v34  ;;  %v2066_v37 = vpop.f32.mrb[3].mxu0 }
 0x28d   : > { %v3470_v35 = vpack.c.bf16 %v904_v30, %v901_v29  ;;  %v3472_v38 = vpack.c.bf16 %v792_v36, %v789_v32 }
 0x28f   : > { %v1027_v39 = vsel %vm1022_vm1, %v3470_v35, 0 }
 0x290   : > { %2108 = vmatpush3.bf16.xpose.msra.mxu1 %v1027_v39 }
 0x291   : > { %2113 = vmatprep.subr.bf16.mxu1 %v2896_v0 }
 0x297   : > { %2110 = vmatmul.mubr.msk.bf16.vlgmr.msra.gmra.mrb[4].mxu1 %vm1022_vm1, %v3472_v38 }
 0x298   : > { %2115 = vmatprep.mubr.msk.bf16.mxu1 %vm2897_vm0, %v2896_v0 }
 0x2a9   : > { %v1012_v13 = vpop.f32.mrb[4].mxu0 }
 0x2aa   : > { %v2105_v14 = vpop.f32.mrb[5].mxu0  ;;  %v1013_v18 = vadd.f32 %v1960_v16, %v1012_v13 }
 0x2ab   : > { %v1015_v15 = vpop.f32.mrb[6].mxu0 }
 0x2ac   : > { %v2106_v17 = vpop.f32.mrb[7].mxu0  ;;  %v1016_v19 = vadd.f32 %v1960_v16, %v1015_v15 }
 0x2ae   : > { %v3512_v20 = vpack.c.bf16 %v1016_v19, %v1013_v18 }
 0x2b0   : > { %2114 = vmatpush3.bf16.msra.mxu1 %v3512_v20 }
 0x2b1   : > { %2119 = vmatprep.subr.bf16.mxu1 %v2896_v0 }
 0x36a   : > { %v1063_v58 = vpop.f32.mrb[4].mxu1 }
 0x36b   : > { %v1076_v59 = vsel %vm1075_vm3, %v1063_v58, -1e+09  ;;  %v2111_v60 = vpop.f32.mrb[5].mxu1 }
 0x36c   : > { %v1066_v61 = vpop.f32.mrb[6].mxu1  ;;  %v1079_v62 = vsel %vm1078_vm4, %v1076_v59, -inf }
 0x36d   : > { %v1077_v63 = vsel %vm1075_vm3, %v1066_v61, -1e+09  ;;  %1080 = vmax.xlane.f32.xlu0 %v1079_v62  ;;  %v2112_v1 = vpop.f32.mrb[7].mxu1 }
 0x36e   : > { %v1082_v2 = vsel %vm1078_vm4, %v1077_v63, -inf }
 0x371   : > { %1083 = vmax.xlane.f32.xlu0 %v1082_v2 }
 0x387   : > { %1150 = vrot.lane.b32.xlu0 %v3470_v35, %s2899_s30 }
 0x3fa   : > { %v1081_v3 = vpop.xlane.xlu0 %1080 }
 0x3fb   : > { %v1085_v4 = vsub.f32 %v1076_v59, %v1081_v3 }
 0x3fd   : > { %v1087_v5 = vmul.f32 1.442695, %v1085_v4 }
 0x3fe   : > { %v1084_v6 = vpop.xlane.xlu0 %1083 }
 0x3ff   : > { %2392 = vpow2.f32 %v1087_v5  ;;  %v1086_v7 = vsub.f32 %v1077_v63, %v1084_v6 }
 0x401   : > { %v1089_v8 = vmul.f32 1.442695, %v1086_v7 }
 0x402   : > { %v1151_v27 = vpop.permute.xlu0 %1150 }
 0x403   : > { %2394 = vpow2.f32 %v1089_v8  ;;  %v1156_v29 = vsel %vm1022_vm1, %v1151_v27, 0 }
 0x409   : > { %v2393_v9 = vpop.eup %2392 }
 0x40a   : > { %v1091_v10 = vsel %vm1078_vm4, %v2393_v9, 0.0 }
 0x40b   : > { %1092 = vadd.xlane.f32.xlu1 %v1091_v10 }
 0x40d   : > { %v2395_v11 = vpop.eup %2394 }
 0x40e   : > { %v1094_v12 = vsel %vm1078_vm4, %v2395_v11, 0.0 }
 0x40f   : > { %1095 = vadd.xlane.f32.xlu1 %v1094_v12 }
 0x420   : > { %1147 = vrot.lane.b32.xlu1 %v3472_v38, %s2899_s30 }
 0x498   : > { %v1093_v21 = vpop.xlane.xlu1 %1092 }
 0x499   : > { %2396 = vrcp.f32 %v1093_v21 }
 0x49c   : > { %v1096_v22 = vpop.xlane.xlu1 %1095 }
 0x49d   : > { %2398 = vrcp.f32 %v1096_v22 }
 0x4a0   : > { %v1148_v30 = vpop.permute.xlu1 %1147 }
 0x4a3   : > { %v2397_v23 = vpop.eup %2396 }
 0x4a4   : > { %v1099_v25 = vmul.f32 %v2397_v23, %v2393_v9 }
 0x4a7   : > { %v2399_v24 = vpop.eup %2398 }
 0x4a8   : > { %v1100_v26 = vmul.f32 %v2399_v24, %v2395_v11 }
 0x4aa   : > { %v1101_v28 = vpack.c.bf16 %v1100_v26, %v1099_v25 }
 0x4ac   : > { %2116 = vmatmul.mubr.msk.bf16.vlgmr.msra.gmra.mrb[8].mxu1 %vm1078_vm4, %v1101_v28 }
 0x4ad   : > { %2120 = vmatpush3.bf16.xpose.msra.mxu1 %v1156_v29  ;;  %2121 = vmatprep.mubr.msk.bf16.mxu1 %vm2897_vm0, %v2896_v0 }
 0x4ae   : > { %2125 = vmatprep.subr.bf16.mxu1 %v2896_v0 }
 0x4b4   : > { %2122 = vmatmul.mubr.msk.bf16.vlgmr.msra.gmra.mrb[12].mxu1 %vm1022_vm1, %v1148_v30 }
 0x4b5   : > { %2127 = vmatprep.mubr.msk.bf16.mxu1 %vm2897_vm0, %v2896_v0 }
 0x57f   : > { %v3524_v31 = vpop.f32.mrb[8].mxu1 }
 0x580   : > { %v2117_v32 = vpop.f32.mrb[9].mxu1 }
 0x581   : > { %v3526_v33 = vpop.f32.mrb[10].mxu1 }
 0x582   : > { %v2118_v34 = vpop.f32.mrb[11].mxu1 }
 0x587   : > { %v1192_v36 = vpop.f32.mrb[12].mxu1 }
 0x588   : > { %v1199_v37 = vsel %vm1075_vm3, %v1192_v36, -1e+09  ;;  %v2123_v39 = vpop.f32.mrb[13].mxu1 }
 0x589   : > { %v1195_v40 = vpop.f32.mrb[14].mxu1  ;;  %v1201_v41 = vsel %vm1078_vm4, %v1199_v37, -inf }
 0x58a   : > { %v1200_v42 = vsel %vm1075_vm3, %v1195_v40, -1e+09  ;;  %1202 = vmax.xlane.f32.xlu1 %v1201_v41  ;;  %v2124_v43 = vpop.f32.mrb[15].mxu1 }
 0x58b   : > { %v1204_v44 = vsel %vm1078_vm4, %v1200_v42, -inf }
 0x58c   : > { %1205 = vmax.xlane.f32.xlu0 %v1204_v44 }
 0x617   : > { %v1203_v45 = vpop.xlane.xlu1 %1202 }
 0x618   : > { %v1207_v46 = vsub.f32 %v1199_v37, %v1203_v45 }
 0x619   : > { %v1206_v47 = vpop.xlane.xlu0 %1205 }
 0x61a   : > { %v1209_v48 = vmul.f32 1.442695, %v1207_v46  ;;  %v1208_v49 = vsub.f32 %v1200_v42, %v1206_v47 }
 0x61c   : > { %2400 = vpow2.f32 %v1209_v48  ;;  %v1211_v50 = vmul.f32 1.442695, %v1208_v49 }
 0x61e   : > { %2402 = vpow2.f32 %v1211_v50 }
 0x626   : > { %v2401_v51 = vpop.eup %2400 }
 0x627   : > { %v1213_v52 = vsel %vm1078_vm4, %v2401_v51, 0.0 }
 0x628   : > { %v2403_v53 = vpop.eup %2402  ;;  %1214 = vadd.xlane.f32.xlu0 %v1213_v52 }
 0x629   : > { %v1216_v54 = vsel %vm1078_vm4, %v2403_v53, 0.0 }
 0x62a   : > { %1217 = vadd.xlane.f32.xlu1 %v1216_v54 }
 0x63b   : > { %1274 = vrot.lane.b32.xlu1 %v3470_v35, %s2900_s0 }
 0x63e   : > { %1225 = vrot.lane.b32.xlu0 %v3512_v20, %s2899_s30 }
 0x63f   : > { %1272 = vrot.lane.b32.xlu1 %v3472_v38, %s2900_s0 }
 0x6b5   : > { %v1215_v55 = vpop.xlane.xlu0 %1214 }
 0x6b6   : > { %2404 = vrcp.f32 %v1215_v55 }
 0x6b7   : > { %v1218_v56 = vpop.xlane.xlu1 %1217 }
 0x6b8   : > { %2406 = vrcp.f32 %v1218_v56 }
 0x6b9   : > { %v1226_v58 = vpop.permute.xlu0 %1225 }
 0x6ba   : > { %2126 = vmatpush3.bf16.msra.mxu1 %v1226_v58 }
 0x6bb   : > { %2131 = vmatprep.subr.bf16.mxu1 %v2896_v0  ;;  %v1275_v63 = vpop.permute.xlu1 %1274 }
 0x6bc   : > { %v1280_v2 = vsel %vm1022_vm1, %v1275_v63, 0 }
 0x6bf   : > { %v1273_v3 = vpop.permute.xlu1 %1272 }
 0x6c0   : > { %v2405_v59 = vpop.eup %2404 }
 0x6c1   : > { %v1221_v61 = vmul.f32 %v2405_v59, %v2401_v51 }
 0x6c2   : > { %v2407_v60 = vpop.eup %2406 }
 0x6c3   : > { %v1222_v62 = vmul.f32 %v2407_v60, %v2403_v53 }
 0x6c5   : > { %v1223_v1 = vpack.c.bf16 %v1222_v62, %v1221_v61 }
 0x6c7   : > { %2128 = vmatmul.mubr.msk.bf16.vlgmr.msra.gmra.mrb[16].mxu1 %vm1078_vm4, %v1223_v1 }
 0x6c8   : > { %2132 = vmatpush3.bf16.xpose.msra.mxu1 %v1280_v2  ;;  %2133 = vmatprep.mubr.msk.bf16.mxu1 %vm2897_vm0, %v2896_v0 }
 0x6c9   : > { %2137 = vmatprep.subr.bf16.mxu1 %v2896_v0 }
 0x6cf   : > { %2134 = vmatmul.mubr.msk.bf16.vlgmr.msra.gmra.mrb[20].mxu1 %vm1022_vm1, %v1273_v3 }
 0x6d0   : > { %2139 = vmatprep.mubr.msk.bf16.mxu1 %vm2897_vm0, %v2896_v0 }
 0x79a   : > { %v3551_v4 = vpop.f32.mrb[16].mxu1 }
 0x79b   : > { %v2129_v5 = vpop.f32.mrb[17].mxu1 }
 0x79c   : > { %v3553_v6 = vpop.f32.mrb[18].mxu1 }
 0x79d   : > { %v2345_v7 = vpack.i.bf16 %v3553_v6, %v3551_v4  ;;  %v2130_v8 = vpop.f32.mrb[19].mxu1  ;;  %v2384_v4 = vld [vmem:[#allocation19] sm:$0xff]   ;;  %v2385_v6 = vld [vmem:[#allocation19 + $0x8] sm:$0xff]  }
 0x79e   : > { %2156 = vmatpush3.bf16.msra.mxu0 %v2384_v4 }
 0x79f   : > { %2157 = vmatprep.subr.bf16.mxu0 %v2896_v0 }
 0x7a2   : > { %v1316_v9 = vpop.f32.mrb[20].mxu1  ;;  %2158 = vmatpush3.bf16.msra.mxu0 %v2385_v6 }
 0x7a3   : > { %v1323_v10 = vsel %vm1075_vm3, %v1316_v9, -1e+09  ;;  %v2135_v11 = vpop.f32.mrb[21].mxu1  ;;  %2159 = vmatprep.subr.bf16.mxu0 %v2896_v0 }
 0x7a4   : > { %v1319_v12 = vpop.f32.mrb[22].mxu1  ;;  %v1325_v13 = vsel %vm1078_vm4, %v1323_v10, -inf }
 0x7a5   : > { %v1324_v14 = vsel %vm1075_vm3, %v1319_v12, -1e+09  ;;  %1326 = vmax.xlane.f32.xlu1 %v1325_v13  ;;  %v2136_v15 = vpop.f32.mrb[23].mxu1  ;;  %v2388_v12 = vld [vmem:[#allocation19 + $0x20] sm:$0xff]   ;;  %v2389_v13 = vld [vmem:[#allocation19 + $0x28] sm:$0xff]  }
 0x7a6   : > { %v1328_v16 = vsel %vm1078_vm4, %v1324_v14, -inf  ;;  %v2391_v15 = vld [vmem:[#allocation19 + $0x38] sm:$0xff]  }
 0x7a7   : > { %1329 = vmax.xlane.f32.xlu0 %v1328_v16 }
 0x7b6   : > { %1348 = vrot.lane.b32.xlu1 %v3512_v20, %s2900_s0 }
 0x7ba   : > { %1395 = vrot.lane.b32.xlu1 %v3472_v38, %s2901_s14 }
 0x832   : > { %v1327_v17 = vpop.xlane.xlu1 %1326 }
 0x833   : > { %v1331_v18 = vsub.f32 %v1323_v10, %v1327_v17 }
 0x834   : > { %v1330_v19 = vpop.xlane.xlu0 %1329 }
 0x835   : > { %v1333_v21 = vmul.f32 1.442695, %v1331_v18  ;;  %v1332_v22 = vsub.f32 %v1324_v14, %v1330_v19  ;;  %v2390_v14 = vld [vmem:[#allocation19 + $0x30] sm:$0xff]  }
 0x836   : > { %v1349_v23 = vpop.permute.xlu1 %1348 }
 0x837   : > { %2408 = vpow2.f32 %v1333_v21  ;;  %v1335_v24 = vmul.f32 1.442695, %v1332_v22  ;;  %2138 = vmatpush3.bf16.msra.mxu1 %v1349_v23 }
 0x838   : > { %2143 = vmatprep.subr.bf16.mxu1 %v2896_v0 }
 0x839   : > { %2410 = vpow2.f32 %v1335_v24 }
 0x841   : > { %v2409_v25 = vpop.eup %2408 }
 0x842   : > { %v1337_v26 = vsel %vm1078_vm4, %v2409_v25, 0.0 }
 0x843   : > { %v2411_v27 = vpop.eup %2410  ;;  %1338 = vadd.xlane.f32.xlu0 %v1337_v26 }
 0x844   : > { %v1340_v28 = vsel %vm1078_vm4, %v2411_v27, 0.0 }
 0x847   : > { %1341 = vadd.xlane.f32.xlu0 %v1340_v28 }
 0x85d   : > { %1397 = vrot.lane.b32.xlu0 %v3470_v35, %s2901_s14  ;;  %v1396_v35 = vpop.permute.xlu1 %1395 }
 0x8d0   : > { %v1339_v38 = vpop.xlane.xlu0 %1338 }
 0x8d1   : > { %2412 = vrcp.f32 %v1339_v38 }
 0x8d4   : > { %v1342_v29 = vpop.xlane.xlu0 %1341 }
 0x8d5   : > { %2414 = vrcp.f32 %v1342_v29 }
 0x8d8   : > { %v1398_v37 = vpop.permute.xlu0 %1397 }
 0x8d9   : > { %v1403_v40 = vsel %vm1022_vm1, %v1398_v37, 0 }
 0x8db   : > { %v2413_v30 = vpop.eup %2412 }
 0x8dc   : > { %v1345_v34 = vmul.f32 %v2413_v30, %v2409_v25 }
 0x8df   : > { %v2415_v32 = vpop.eup %2414 }
 0x8e0   : > { %v1346_v36 = vmul.f32 %v2415_v32, %v2411_v27 }
 0x8e2   : > { %v1347_v39 = vpack.c.bf16 %v1346_v36, %v1345_v34 }
 0x8e4   : > { %2140 = vmatmul.mubr.msk.bf16.vlgmr.msra.gmra.mrb[24].mxu1 %vm1078_vm4, %v1347_v39 }
 0x8e5   : > { %2144 = vmatpush3.bf16.xpose.msra.mxu1 %v1403_v40  ;;  %2145 = vmatprep.mubr.msk.bf16.mxu1 %vm2897_vm0, %v2896_v0  ;;  %v1977_v40 = vld [vmem:[#allocation20] ss:$0 sm:$0xff] }
 0x8e6   : > { %2149 = vmatprep.subr.bf16.mxu1 %v2896_v0 }
 0x8ec   : > { %2146 = vmatmul.mubr.msk.bf16.vlgmr.msra.gmra.mrb[28].mxu1 %vm1022_vm1, %v1396_v35 }
 0x8ed   : > { %2151 = vmatprep.mubr.msk.bf16.mxu1 %vm2897_vm0, %v2896_v0 }
 0x9b7   : > { %v1388_v41 = vpop.f32.mrb[24].mxu1 }
 0x9b8   : > { %v2141_v42 = vpop.f32.mrb[25].mxu1 }
 0x9b9   : > { %v1391_v43 = vpop.f32.mrb[26].mxu1 }
 0x9ba   : > { %v2350_v44 = vpack.i.bf16 %v1391_v43, %v1388_v41  ;;  %v2142_v45 = vpop.f32.mrb[27].mxu1 }
 0x9bf   : > { %v1439_v46 = vpop.f32.mrb[28].mxu1 }
 0x9c0   : > { %v1446_v47 = vsel %vm1075_vm3, %v1439_v46, -1e+09  ;;  %v2147_v48 = vpop.f32.mrb[29].mxu1 }
 0x9c1   : > { %v1442_v49 = vpop.f32.mrb[30].mxu1  ;;  %v1448_v50 = vsel %vm1078_vm4, %v1446_v47, -inf }
 0x9c2   : > { %v1447_v51 = vsel %vm1075_vm3, %v1442_v49, -1e+09  ;;  %1449 = vmax.xlane.f32.xlu1 %v1448_v50  ;;  %v2148_v52 = vpop.f32.mrb[31].mxu1 }
 0x9c3   : > { %v1451_v53 = vsel %vm1078_vm4, %v1447_v51, -inf }
 0x9c4   : > { %1452 = vmax.xlane.f32.xlu0 %v1451_v53 }
 0xa4f   : > { %v1450_v54 = vpop.xlane.xlu1 %1449 }
 0xa50   : > { %v1454_v55 = vsub.f32 %v1446_v47, %v1450_v54 }
 0xa51   : > { %v1453_v56 = vpop.xlane.xlu0 %1452 }
 0xa52   : > { %v1456_v58 = vmul.f32 1.442695, %v1454_v55  ;;  %v1455_v59 = vsub.f32 %v1447_v51, %v1453_v56 }
 0xa54   : > { %2416 = vpow2.f32 %v1456_v58  ;;  %v1458_v60 = vmul.f32 1.442695, %v1455_v59 }
 0xa56   : > { %2418 = vpow2.f32 %v1458_v60 }
 0xa5e   : > { %v2417_v61 = vpop.eup %2416 }
 0xa5f   : > { %v1460_v62 = vsel %vm1078_vm4, %v2417_v61, 0.0 }
 0xa60   : > { %v2419_v63 = vpop.eup %2418  ;;  %1461 = vadd.xlane.f32.xlu0 %v1460_v62 }
 0xa61   : > { %v1463_v57 = vsel %vm1078_vm4, %v2419_v63, 0.0 }
 0xa62   : > { %1464 = vadd.xlane.f32.xlu1 %v1463_v57 }
 0xa73   : > { %2346 = vrot.lane.b32.xlu1 %v2345_v7, %s2901_s14  ;;  %v2387_v7 = vld [vmem:[#allocation19 + $0x18] sm:$0xff]  }
 0xa76   : > { %1471 = vrot.lane.b32.xlu0 %v3512_v20, %s2901_s14  ;;  %v2386_v20 = vld [vmem:[#allocation19 + $0x10] sm:$0xff]  }
 0xa77   : > { %2351 = vrot.lane.b32.xlu1 %v2350_v44, %s2900_s0  ;;  %2160 = vmatpush3.bf16.msra.mxu0 %v2386_v20 }
 0xa78   : > { %2161 = vmatprep.subr.bf16.mxu0 %v2896_v0 }
 0xa7b   : > { %2162 = vmatpush3.bf16.msra.mxu0 %v2387_v7 }
 0xa7c   : > { %2163 = vmatprep.subr.bf16.mxu0 %v2896_v0 }
 0xa7f   : > { %2164 = vmatpush3.bf16.msra.mxu0 %v2388_v12 }
 0xa80   : > { %2165 = vmatprep.subr.bf16.mxu0 %v2896_v0 }
 0xa83   : > { %2166 = vmatpush3.bf16.msra.mxu0 %v2389_v13 }
 0xa84   : > { %2167 = vmatprep.subr.bf16.mxu0 %v2896_v0 }
 0xa87   : > { %2168 = vmatpush3.bf16.msra.mxu0 %v2390_v14 }
 0xa88   : > { %2169 = vmatprep.subr.bf16.mxu0 %v2896_v0 }
 0xa8b   : > { %2170 = vmatpush3.bf16.msra.mxu0 %v2391_v15 }
 0xaed   : > { %v1462_v1 = vpop.xlane.xlu0 %1461 }
 0xaee   : > { %2420 = vrcp.f32 %v1462_v1 }
 0xaef   : > { %v1465_v2 = vpop.xlane.xlu1 %1464 }
 0xaf0   : > { %2422 = vrcp.f32 %v1465_v2 }
 0xaf1   : > { %v1472_v3 = vpop.permute.xlu0 %1471 }
 0xaf2   : > { %2150 = vmatpush3.bf16.msra.mxu1 %v1472_v3 }
 0xaf3   : > { %v2347_v22 = vpop.permute.xlu1 %2346 }
 0xaf4   : > { %v2349_v24 = vunpack.i.h.bf16 %v2347_v22  ;;  %v2348_v25 = vunpack.i.l.bf16 %v2347_v22 }
 0xaf6   : > { %v1543_v28 = vsel %vm1022_vm1, %v3526_v33, %v2349_v24  ;;  %v1542_v38 = vsel %vm1022_vm1, %v3524_v31, %v2348_v25 }
 0xaf7   : > { %v2352_v23 = vpop.permute.xlu1 %2351 }
 0xaf8   : > { %v2421_v5 = vpop.eup %2420  ;;  %v2354_v26 = vunpack.i.h.bf16 %v2352_v23  ;;  %v2353_v27 = vunpack.i.l.bf16 %v2352_v23 }
 0xaf9   : > { %v1468_v9 = vmul.f32 %v2421_v5, %v2417_v61 }
 0xafa   : > { %v2423_v8 = vpop.eup %2422  ;;  %v1545_v32 = vsel %vm1544_vm5, %v1542_v38, %v2353_v27  ;;  %v1546_v34 = vsel %vm1544_vm5, %v1543_v28, %v2354_v26 }
 0xafb   : > { %v1469_v10 = vmul.f32 %v2423_v8, %v2419_v63 }
 0xafd   : > { %v1470_v11 = vpack.c.bf16 %v1469_v10, %v1468_v9 }
 0xaff   : > { %2152 = vmatmul.mubr.msk.bf16.vlgmr.msra.gmra.mrb[32].mxu1 %vm1078_vm4, %v1470_v11 }
 0xbd2   : > { %v1511_v16 = vpop.f32.mrb[32].mxu1 }
 0xbd3   : > { %v2153_v17 = vpop.f32.mrb[33].mxu1 }
 0xbd4   : > { %v1514_v18 = vpop.f32.mrb[34].mxu1 }
 0xbd5   : > { %v2355_v19 = vpack.i.bf16 %v1514_v18, %v1511_v16  ;;  %v2154_v21 = vpop.f32.mrb[35].mxu1 }
 0xbd7   : > { %2356 = vrot.lane.b32.xlu1 %v2355_v19, %s2899_s30 }
 0xc49   : > { %v2357_v0 = vpop.permute.xlu1 %2356 }
 0xc4a   : > { %v2359_v29 = vunpack.i.h.bf16 %v2357_v0  ;;  %v2358_v30 = vunpack.i.l.bf16 %v2357_v0 }
 0xc4c   : > { %v1549_v36 = vsel %vm1547_vm6, %v1546_v34, %v2359_v29  ;;  %v1548_v37 = vsel %vm1547_vm6, %v1545_v32, %v2358_v30 }
 0xc4d   : > { %v1550_v39 = vpack.c.bf16 %v1549_v36, %v1548_v37 }
 0xc4f   : > { %2172 = vmatmul.mubr.bf16.vlgmr.msra.gmra.mrb[8].mxu0 %v1550_v39 }
 0xd22   : > { %v1656_v35 = vpop.f32.mrb[8].mxu0 }
 0xd23   : > { %v1657_v41 = vadd.f32 %v1977_v40, %v1656_v35  ;;  %v2173_v31 = vpop.f32.mrb[9].mxu0 }
 0xd24   : > { %v1659_v33 = vpop.f32.mrb[10].mxu0 }
 0xd25   : > { %1663 = vst [vmem:[%s668_s17] sm:$0xff] %v1657_v41  ;;  %v1660_v42 = vadd.f32 %v1977_v40, %v1659_v33  ;;  %v2174_v43 = vpop.f32.mrb[11].mxu0 }
 0xd27   : > { %1664 = vst [vmem:[%s668_s17 + $0x8] sm:$0xff] %v1660_v42 }
 0xd28   : > { %2781 = shalt.err (!%p2778_p1)
}
 0xd29   : > { %s2782_s28 = scalar_lea.hbm %s3615_s21, 256  ;;  %s2786_s30 = scalar_lea.hbm %s3775_s1, 512 }
 0xd2a   : > { %p2783_p9 = scmp.ne.s32.totalorder %s3615_s21, %s2782_s28  ;;  %p2787_p11 = scmp.lt.u32.totalorder %s3615_s21, %s3775_s1 }
 0xd2b   : > { %p2788_p0 = scmp.lt.u32.totalorder %s2786_s30, %s2782_s28  ;;  %p2790_p2 = scmp.lt.u32.totalorder %s2782_s28, %s3615_s21 }
 0xd2c   : > { %p2784_p10 = pnand %p2783_p9, %p3776_p4 }
 0xd2d   : > { %p2789_p3 = por %p2788_p0, %p2787_p11 }
 0xd2e   : > { %p2785_p5 = pneg %p2784_p10 }
 0xd2f   : > { %p2791_p13 = por %p2790_p2, %p2789_p3 }
 0xd31   : > { %p2792_p6 = pnand %p2791_p13, %p2785_p5 }
 0xd33   : > { %2795 = shalt.err (!%p2792_p6)
}
 0xd34   : > { %s2903_s19 = smov 128   ;;  %s2904_s17 = smov 8  }
 0xd35   : > { %2215 = dma.vmem_to_hbm [thread:$0]  (%p3776_p4), %s3610_s13, 256, %s3615_s21, %s1666_s18, %s2903_s19, %s2903_s19, %s2904_s17  }
 0xd36 PF: > { %s3777_s5 = sld [smem:[#allocation32_spill]]  ;;  %s3778_s29 = sld [smem:[#allocation40_spill]] }
 0xd37   : > { %p3780_p8 = scmp.ge.s32.totalorder %s2878_s26, 2 }
 0xd3c   : > { %s1696_s23 = sand.u32 1, %s3777_s5   ;;  %p3779_p7 = scmp.ne.s32.totalorder %s3778_s29, 0 }
 0xd3d   : > { %s1697_s20 = scalar_lea.sflag [#allocation4], %s1696_s23 }
 0xd3e   : > { %p2256_p12 = pnand %p3780_p8, %p3779_p7 }
 0xd40   : > { %2853 = dma.done.wait (!%p2256_p12), %s1697_s20, 256  }
 0xd41   : > { %2855 = vsyncadd (!%p2256_p12), %s1697_s20, 4294967040  ;;  %s38_s26 = sadd.s32 1, %s2878_s26   ;;  %s3781_s4 = sld [smem:[#allocation33_spill]] }
 0xd42   : > { %p35_p1 = scmp.ge.s32.totalorder %s38_s26, 4   ;;  %s3782_s23 = sld [smem:[#allocation39_spill]] }
 0xd43   : > { %s3783_s9 = sld [smem:[#allocation37_spill]]  ;;  %s3784_s21 = smov %s2862_s22 }
 0xd44   : > { %s3786_s24 = smov %s2874_s25  ;;  %37 = sbr.rel (!%p35_p1) target bundleno = 24 (0x18), region = 182 }
 0xd47   : > { %s3785_s22 = smov %s3781_s4 }
 0xd49   : > { %s3787_s25 = smov %s3783_s9 }
 0xd4b   :  { %1702 = vsyncpa [#allocation3], 1 }
 0xd4c   :  { %1704 = vsyncpa [#allocation3 + $0x1], 1 }
 0xd4d   :  { %1705 = vsyncpa [#allocation6], 1 }
 0xd4e   :  { %1707 = vsyncpa [#allocation6 + $0x1], 1 }
 0xd4f   :  { %1708 = vsyncpa [#allocation9], 1 }
 0xd50   :  { %1710 = vsyncpa [#allocation9 + $0x1], 1 }
 0xd51   :  { %1711 = vsyncpa [#allocation12], 1 }
 0xd52   :  { %1712 = vsyncpa [#allocation15], 1 }
 0xd53   :  { %1713 = vsyncpa [#allocation18], 1 }
 0xd54   :  { %1714 = vsyncpa [#allocation21], 1 }
 0xd55   :  { %1715 = vsyncpa [#allocation4], 1 }
 0xd56   :  { %1717 = vsyncpa [#allocation4 + $0x1], 1 }

</bundles_post_ra>
